<compile_context>
chip_gen: v7x
topology: tpu7x:2x2x1
jax: 0.10.0
libtpu: 0.0.40
codegen_flags: <defaults>
</compile_context>

<pallas_src>
import jax
import jax.numpy as jnp
from jax.experimental import pallas as pl
from jax.experimental.pallas import tpu as pltpu


def actor_kernel(s_ref, w1_ref, b1_ref, w2_ref, b2_ref, w3_ref, b3_ref, out_ref):
    s = s_ref[...]                          # [TB, state_dim]
    tb = s_ref.shape[0]
    state_dim = s_ref.shape[1]

    # ---- Layer 1: Linear(state_dim -> 128) + ReLU, done on the VPU ----------
    # K is tiny (e.g. 4): a matmul would pay full MXU fill/drain for 4 columns.
    # Instead do an unrolled broadcast-FMA: h1 = b1 + sum_k s[:, k] * w1[k, :].
    h1 = jnp.broadcast_to(b1_ref[...], (tb, b1_ref.shape[1]))
    for k in range(state_dim):              # static unroll (state_dim is small)
        h1 = h1 + s[:, k:k + 1] * w1_ref[k:k + 1, :]
    h1 = jnp.maximum(h1, 0.0)

    # ---- Layer 2: Linear(128 -> 128) + ReLU, dense MXU matmul ---------------
    h2 = jnp.dot(h1, w2_ref[...], preferred_element_type=jnp.float32)
    h2 = jnp.maximum(h2 + b2_ref[...], 0.0)

    # ---- Output: Linear(128 -> 128-padded) + scaled sigmoid -----------------
    logits = jnp.dot(h2, w3_ref[...], preferred_element_type=jnp.float32)
    logits = logits + b3_ref[...]
    # Exact identity: 4*sigmoid(x) - 2 == 2*tanh(x/2)
    out_ref[...] = (2.0 * jnp.tanh(0.5 * logits)).astype(out_ref.dtype)


def _pick_batch_tile(B):
    """Largest convenient batch tile (multiple of 8, amortizes per-step overhead)."""
    for tb in (512, 256, 128):
        if B >= tb:
            return tb
    return max(8, ((B + 7) // 8) * 8)       # tiny batch: single block


def actor_forward(s, w1, b1, w2, b2, w3, b3):
    """s: [B, state_dim]; wK: [in, out]; bK: [1, out]. Returns [B, action_dim] f32."""
    B, state_dim = s.shape
    hidden = w1.shape[1]
    action_dim = w3.shape[1]
    PAD = 128                                # lane-dense output width

    # Zero-pad the output layer to 128 lanes (unmasked stores); slice back later.
    w3p = jnp.zeros((hidden, PAD), jnp.float32).at[:, :action_dim].set(w3)
    b3p = jnp.zeros((1, PAD), jnp.float32).at[:, :action_dim].set(b3)

    # Pad batch up to a multiple of the batch tile.
    tb = _pick_batch_tile(B)
    Bp = ((B + tb - 1) // tb) * tb
    sp = s if Bp == B else jnp.pad(s, ((0, Bp - B), (0, 0)))

    # Weights use a constant block index -> loaded once, VMEM-resident across
    # all grid steps; only the activations stream through the pipeline.
    def weight_spec(shape):
        return pl.BlockSpec(shape, lambda i: (0, 0))

    out = pl.pallas_call(
        actor_kernel,
        out_shape=jax.ShapeDtypeStruct((Bp, PAD), jnp.float32),
        grid=(Bp // tb,),
        in_specs=[
            pl.BlockSpec((tb, state_dim), lambda i: (i, 0)),
            weight_spec(w1.shape), weight_spec(b1.shape),
            weight_spec(w2.shape), weight_spec(b2.shape),
            weight_spec(w3p.shape), weight_spec(b3p.shape),
        ],
        out_specs=pl.BlockSpec((tb, PAD), lambda i: (i, 0)),
        compiler_params=pltpu.CompilerParams(
            dimension_semantics=("parallel",)),
    )(sp, w1, b1, w2, b2, w3p, b3p)

    return out[:B, :action_dim]


def init_linear_params(key, in_features, out_features):
    """Mimics torch.nn.Linear default init U[-1/sqrt(in), 1/sqrt(in)].
    Returns weight transposed to [in, out] plus bias [1, out]."""
    kw, kb = jax.random.split(key)
    bound = 1.0 / jnp.sqrt(jnp.float32(in_features))
    w = jax.random.uniform(kw, (in_features, out_features), jnp.float32, -bound, bound)
    b = jax.random.uniform(kb, (1, out_features), jnp.float32, -bound, bound)
    return w, b


def reference_forward(s, w1, b1, w2, b2, w3, b3):
    h1 = jax.nn.relu(s @ w1 + b1)
    h2 = jax.nn.relu(h1 @ w2 + b2)
    a = jax.nn.sigmoid(h2 @ w3 + b3)
    return 4.0 * a - 2.0


if __name__ == "__main__":
    # DDPG actor shapes: state_dim=4, hidden=128, action_dim=2.
    state_dim, hidden, action_dim = 4, 128, 2

    key = jax.random.PRNGKey(0)
    k_s, k1, k2, k3 = jax.random.split(key, 4)

    w1, b1 = init_linear_params(k1, state_dim, hidden)
    w2, b2 = init_linear_params(k2, hidden, hidden)
    w3, b3 = init_linear_params(k3, hidden, action_dim)

    # Batched path: many states per call (training-batch style), 2 grid steps.
    s_big = jax.random.normal(k_s, (256, state_dim), jnp.float32)
    out_big = jax.block_until_ready(actor_forward(s_big, w1, b1, w2, b2, w3, b3))
    ref_big = reference_forward(s_big, w1, b1, w2, b2, w3, b3)
    assert out_big.shape == (256, action_dim)
    assert jnp.allclose(out_big, ref_big, atol=1e-5, rtol=1e-5), "batched mismatch"

    # Small path: tiny rollout batch (single block, no grid padding issues).
    s_small = jax.random.normal(jax.random.fold_in(k_s, 1), (8, state_dim), jnp.float32)
    out_small = jax.block_until_ready(actor_forward(s_small, w1, b1, w2, b2, w3, b3))
    ref_small = reference_forward(s_small, w1, b1, w2, b2, w3, b3)
    assert out_small.shape == (8, action_dim)
    assert jnp.allclose(out_small, ref_small, atol=1e-5, rtol=1e-5), "small mismatch"

    print("KERNEL_OK")
</pallas_src>

<mosaic_0001>
module attributes {stable_mosaic.version = 11 : i64} {
  func.func @actor_kernel(%arg0: i32, %arg1: memref<256x4xf32, #tpu.memory_space<vmem>>, %arg2: memref<4x128xf32, #tpu.memory_space<vmem>>, %arg3: memref<1x128xf32, #tpu.memory_space<vmem>>, %arg4: memref<128x128xf32, #tpu.memory_space<vmem>>, %arg5: memref<1x128xf32, #tpu.memory_space<vmem>>, %arg6: memref<128x128xf32, #tpu.memory_space<vmem>>, %arg7: memref<1x128xf32, #tpu.memory_space<vmem>>, %arg8: memref<256x128xf32, #tpu.memory_space<vmem>>) attributes {dimension_semantics = [#tpu.dimension_semantics<parallel>], iteration_bounds = array<i64: 1>, scalar_prefetch = 0 : i64, scratch_operands = 0 : i64, tpu.core_type = #tpu.core_type<tc>, window_params = [{transform_indices = @transform_0, window_bounds = array<i64: 256, 4>}, {pipeline_mode = #tpu.pipeline_mode<synchronous>, transform_indices = @transform_1, window_bounds = array<i64: 4, 128>}, {pipeline_mode = #tpu.pipeline_mode<synchronous>, transform_indices = @transform_2, window_bounds = array<i64: 1, 128>}, {pipeline_mode = #tpu.pipeline_mode<synchronous>, transform_indices = @transform_3, window_bounds = array<i64: 128, 128>}, {pipeline_mode = #tpu.pipeline_mode<synchronous>, transform_indices = @transform_4, window_bounds = array<i64: 1, 128>}, {pipeline_mode = #tpu.pipeline_mode<synchronous>, transform_indices = @transform_5, window_bounds = array<i64: 128, 128>}, {pipeline_mode = #tpu.pipeline_mode<synchronous>, transform_indices = @transform_6, window_bounds = array<i64: 1, 128>}, {transform_indices = @transform_7, window_bounds = array<i64: 256, 128>}]} {
    %c0 = arith.constant 0 : index
    %c0_0 = arith.constant 0 : index
    %0 = vector.load %arg1[%c0, %c0_0] : memref<256x4xf32, #tpu.memory_space<vmem>>, vector<256x4xf32>
    %c0_1 = arith.constant 0 : index
    %c0_2 = arith.constant 0 : index
    %1 = vector.load %arg3[%c0_1, %c0_2] : memref<1x128xf32, #tpu.memory_space<vmem>>, vector<1x128xf32>
    %2 = vector.shape_cast %1 : vector<1x128xf32> to vector<1x128xf32>
    %3 = vector.broadcast %2 : vector<1x128xf32> to vector<256x128xf32>
    %4 = vector.extract_strided_slice %0 {offsets = [0, 0], sizes = [256, 1], strides = [1, 1]} : vector<256x4xf32> to vector<256x1xf32>
    %c0_3 = arith.constant 0 : index
    %c0_4 = arith.constant 0 : index
    %5 = vector.load %arg2[%c0_3, %c0_4] : memref<4x128xf32, #tpu.memory_space<vmem>>, vector<1x128xf32>
    %6 = vector.broadcast %4 : vector<256x1xf32> to vector<256x128xf32>
    %7 = vector.broadcast %5 : vector<1x128xf32> to vector<256x128xf32>
    %8 = arith.mulf %6, %7 : vector<256x128xf32>
    %9 = arith.addf %3, %8 : vector<256x128xf32>
    %10 = vector.extract_strided_slice %0 {offsets = [0, 1], sizes = [256, 1], strides = [1, 1]} : vector<256x4xf32> to vector<256x1xf32>
    %c1 = arith.constant 1 : index
    %c0_5 = arith.constant 0 : index
    %11 = vector.load %arg2[%c1, %c0_5] : memref<4x128xf32, #tpu.memory_space<vmem>>, vector<1x128xf32>
    %12 = vector.broadcast %10 : vector<256x1xf32> to vector<256x128xf32>
    %13 = vector.broadcast %11 : vector<1x128xf32> to vector<256x128xf32>
    %14 = arith.mulf %12, %13 : vector<256x128xf32>
    %15 = arith.addf %9, %14 : vector<256x128xf32>
    %16 = vector.extract_strided_slice %0 {offsets = [0, 2], sizes = [256, 1], strides = [1, 1]} : vector<256x4xf32> to vector<256x1xf32>
    %c2 = arith.constant 2 : index
    %c0_6 = arith.constant 0 : index
    %17 = vector.load %arg2[%c2, %c0_6] : memref<4x128xf32, #tpu.memory_space<vmem>>, vector<1x128xf32>
    %18 = vector.broadcast %16 : vector<256x1xf32> to vector<256x128xf32>
    %19 = vector.broadcast %17 : vector<1x128xf32> to vector<256x128xf32>
    %20 = arith.mulf %18, %19 : vector<256x128xf32>
    %21 = arith.addf %15, %20 : vector<256x128xf32>
    %22 = vector.extract_strided_slice %0 {offsets = [0, 3], sizes = [256, 1], strides = [1, 1]} : vector<256x4xf32> to vector<256x1xf32>
    %c3 = arith.constant 3 : index
    %c0_7 = arith.constant 0 : index
    %23 = vector.load %arg2[%c3, %c0_7] : memref<4x128xf32, #tpu.memory_space<vmem>>, vector<1x128xf32>
    %24 = vector.broadcast %22 : vector<256x1xf32> to vector<256x128xf32>
    %25 = vector.broadcast %23 : vector<1x128xf32> to vector<256x128xf32>
    %26 = arith.mulf %24, %25 : vector<256x128xf32>
    %27 = arith.addf %21, %26 : vector<256x128xf32>
    %cst = arith.constant 0.000000e+00 : f32
    %28 = vector.broadcast %cst : f32 to vector<256x128xf32>
    %29 = arith.maximumf %27, %28 : vector<256x128xf32>
    %c0_8 = arith.constant 0 : index
    %c0_9 = arith.constant 0 : index
    %30 = vector.load %arg4[%c0_8, %c0_9] : memref<128x128xf32, #tpu.memory_space<vmem>>, vector<128x128xf32>
    %cst_10 = arith.constant dense<0.000000e+00> : vector<256x128xf32>
    %31 = tpu.matmul %29, %30, %cst_10 {dimension_numbers = #tpu.dot_dimension_numbers<[1], [0], [0], [1], [0, 0, 1, 1], [], []>} : vector<256x128xf32>, vector<128x128xf32>, vector<256x128xf32> -> vector<256x128xf32>
    %c0_11 = arith.constant 0 : index
    %c0_12 = arith.constant 0 : index
    %32 = vector.load %arg5[%c0_11, %c0_12] : memref<1x128xf32, #tpu.memory_space<vmem>>, vector<1x128xf32>
    %33 = vector.broadcast %32 : vector<1x128xf32> to vector<256x128xf32>
    %34 = arith.addf %31, %33 : vector<256x128xf32>
    %cst_13 = arith.constant 0.000000e+00 : f32
    %35 = vector.broadcast %cst_13 : f32 to vector<256x128xf32>
    %36 = arith.maximumf %34, %35 : vector<256x128xf32>
    %c0_14 = arith.constant 0 : index
    %c0_15 = arith.constant 0 : index
    %37 = vector.load %arg6[%c0_14, %c0_15] : memref<128x128xf32, #tpu.memory_space<vmem>>, vector<128x128xf32>
    %cst_16 = arith.constant dense<0.000000e+00> : vector<256x128xf32>
    %38 = tpu.matmul %36, %37, %cst_16 {dimension_numbers = #tpu.dot_dimension_numbers<[1], [0], [0], [1], [0, 0, 1, 1], [], []>} : vector<256x128xf32>, vector<128x128xf32>, vector<256x128xf32> -> vector<256x128xf32>
    %c0_17 = arith.constant 0 : index
    %c0_18 = arith.constant 0 : index
    %39 = vector.load %arg7[%c0_17, %c0_18] : memref<1x128xf32, #tpu.memory_space<vmem>>, vector<1x128xf32>
    %40 = vector.broadcast %39 : vector<1x128xf32> to vector<256x128xf32>
    %41 = arith.addf %38, %40 : vector<256x128xf32>
    %cst_19 = arith.constant 5.000000e-01 : f32
    %42 = vector.broadcast %cst_19 : f32 to vector<256x128xf32>
    %43 = arith.mulf %42, %41 : vector<256x128xf32>
    %44 = math.tanh %43 : vector<256x128xf32>
    %cst_20 = arith.constant 2.000000e+00 : f32
    %45 = vector.broadcast %cst_20 : f32 to vector<256x128xf32>
    %46 = arith.mulf %45, %44 : vector<256x128xf32>
    %c0_21 = arith.constant 0 : index
    %c0_22 = arith.constant 0 : index
    %47 = vector.load %arg8[%c0_21, %c0_22] : memref<256x128xf32, #tpu.memory_space<vmem>>, vector<256x128xf32>
    tpu.vector_store %arg8[%c0_21, %c0_22], %46 {strides = array<i32>} : memref<256x128xf32, #tpu.memory_space<vmem>>, vector<256x128xf32>,
    return
  }
  func.func @transform_0(%arg0: i32) -> (i32, i32) {
    %c0_i32 = arith.constant 0 : i32
    %c0_i32_0 = arith.constant 0 : i32
    return %arg0, %c0_i32 : i32, i32
  }
  func.func @transform_1(%arg0: i32) -> (i32, i32) {
    %c0_i32 = arith.constant 0 : i32
    %c0_i32_0 = arith.constant 0 : i32
    %c0_i32_1 = arith.constant 0 : i32
    return %c0_i32, %c0_i32_0 : i32, i32
  }
  func.func @transform_2(%arg0: i32) -> (i32, i32) {
    %c0_i32 = arith.constant 0 : i32
    %c0_i32_0 = arith.constant 0 : i32
    %c0_i32_1 = arith.constant 0 : i32
    return %c0_i32, %c0_i32_0 : i32, i32
  }
  func.func @transform_3(%arg0: i32) -> (i32, i32) {
    %c0_i32 = arith.constant 0 : i32
    %c0_i32_0 = arith.constant 0 : i32
    %c0_i32_1 = arith.constant 0 : i32
    return %c0_i32, %c0_i32_0 : i32, i32
  }
  func.func @transform_4(%arg0: i32) -> (i32, i32) {
    %c0_i32 = arith.constant 0 : i32
    %c0_i32_0 = arith.constant 0 : i32
    %c0_i32_1 = arith.constant 0 : i32
    return %c0_i32, %c0_i32_0 : i32, i32
  }
  func.func @transform_5(%arg0: i32) -> (i32, i32) {
    %c0_i32 = arith.constant 0 : i32
    %c0_i32_0 = arith.constant 0 : i32
    %c0_i32_1 = arith.constant 0 : i32
    return %c0_i32, %c0_i32_0 : i32, i32
  }
  func.func @transform_6(%arg0: i32) -> (i32, i32) {
    %c0_i32 = arith.constant 0 : i32
    %c0_i32_0 = arith.constant 0 : i32
    %c0_i32_1 = arith.constant 0 : i32
    return %c0_i32, %c0_i32_0 : i32, i32
  }
  func.func @transform_7(%arg0: i32) -> (i32, i32) {
    %c0_i32 = arith.constant 0 : i32
    %c0_i32_0 = arith.constant 0 : i32
    return %arg0, %c0_i32 : i32, i32
  }
}

</mosaic_0001>

<bundles_post_ra>
// kernel: tpu_custom_call.1
= control target key start
LH: loop header
LB: loop body
LE: loop exit
PB: predicated region body
PF: predicated region fallthrough
CT: control target
= control target key end

     0   :  { %v2992_v2 = vmov 1   ;;  %s2984_s0 = inlined_call_operand.vmem [shape: f32[256,4], index: 0, kind: input, shape index: {}]   ;;  %s2985_s1 = inlined_call_operand.vmem [shape: f32[4,128], index: 1, kind: input, shape index: {}]   ;;  %s2986_s2 = inlined_call_operand.vmem [shape: f32[1,128], index: 2, kind: input, shape index: {}]   ;;  %s2987_s3 = inlined_call_operand.vmem [shape: f32[128,128], index: 3, kind: input, shape index: {}]   ;;  %s2988_s4 = inlined_call_operand.vmem [shape: f32[1,128], index: 4, kind: input, shape index: {}]   ;;  %s2989_s5 = inlined_call_operand.vmem [shape: f32[128,128], index: 5, kind: input, shape index: {}]   ;;  %s2990_s6 = inlined_call_operand.vmem [shape: f32[1,128], index: 6, kind: input, shape index: {}]   ;;  %s2991_s7 = inlined_call_operand.hbm [shape: f32[256,128], index: 7, kind: output, shape index: {}]  }
   0x1   :  { %v2136_v0 = vld [vmem:[%s2984_s0 + $0x10] sm:$0xff]  ;;  %v2141_v1 = vld [vmem:[%s2984_s0] sm:$0xff]  ;;  %1926 = vset.pattern.permute.xlu0 %v2992_v2  ;;  %1924 = vset.pattern.permute.xlu1 %v2992_v2  ;;  %v2150_v3 = vld [vmem:[%s2984_s0 + $0x38] sm:$0xff] }
   0x2   :  { %305 = vperm.xlu0 %1926, %v2136_v0   ;;  %297 = vperm.xlu1 %1924, %v2141_v1   ;;  %v2155_v4 = vld [vmem:[%s2984_s0 + $0x8] sm:$0xff]  ;;  %v2162_v5 = vld [vmem:[%s2984_s0 + $0x40] sm:$0xff] }
   0x6   :  { %325 = vperm.xlu0 %1926, %v2150_v3   ;;  %301 = vperm.xlu1 %1924, %v2155_v4  }
   0x7   :  { %12 = vsyncpa [#allocation3], 0  ;;  %v2998_v6 = vmov 2   ;;  %v2170_v7 = vld [vmem:[%s2984_s0 + $0x68] sm:$0xff]  ;;  %v2177_v8 = vld [vmem:[%s2984_s0 + $0x70] sm:$0xff]  ;;  %v2996_v9 = vmov 3  }
   0x8   :  { %v2185_v10 = vld [vmem:[%s2984_s0 + $0x28] sm:$0xff]  ;;  %v2191_v11 = vld [vmem:[%s2984_s0 + $0x18] sm:$0xff]  ;;  %v2198_v12 = vld [vmem:[%s2984_s0 + $0x30] sm:$0xff]  ;;  %v2994_v15 = vmov 0  }
   0x9   :  { %v31_v13 = vld [vmem:[%s2984_s0 + $0x20] sm:$0xff]  ;;  %v2208_v14 = vld [vmem:[%s2984_s0 + $0x58] sm:$0xff]  ;;  %v2223_v17 = vld [vmem:[%s2984_s0 + $0x88] sm:$0xff] }
   0xa   :  { %329 = vperm.xlu0 %1926, %v2162_v5   ;;  %1925 = vset.pattern.permute.xlu1 %v2998_v6  ;;  %v2215_v16 = vld [vmem:[%s2984_s0 + $0x60] sm:$0xff]  ;;  %v2230_v18 = vld [vmem:[%s2984_s0 + $0x90] sm:$0xff]  ;;  %v2237_v19 = vld [vmem:[%s2984_s0 + $0xb8] sm:$0xff] }
   0xb   :  { %494 = vperm.xlu1 %1925, %v2141_v1   ;;  %v2244_v20 = vld [vmem:[%s2984_s0 + $0xc0] sm:$0xff]  ;;  %v2266_v21 = vld [vmem:[%s2984_s0 + $0x98] sm:$0xff]  ;;  %v919_v23 = vld [vmem:[%s2987_s3 + $0x8] sm:$0xff] }
   0xc   :  { %v918_v22 = vld [vmem:[%s2987_s3] sm:$0xff]  ;;  %v920_v26 = vld [vmem:[%s2987_s3 + $0x10] sm:$0xff]  ;;  %v921_v27 = vld [vmem:[%s2987_s3 + $0x18] sm:$0xff] }
   0xd   :  { %v1853_v24 = vpack.c.bf16 %v919_v23, %v918_v22  ;;  %v2279_v25 = vld [vmem:[%s2984_s0 + $0xa0] sm:$0xff]  ;;  %v2291_v28 = vld [vmem:[%s2984_s0 + $0x48] sm:$0xff]  ;;  %v1857_v29 = vpack.c.bf16 %v921_v27, %v920_v26  ;;  %v2310_v34 = vld [vmem:[%s2984_s0 + $0xd0] sm:$0xff] }
   0xe   :  { %349 = vperm.xlu0 %1926, %v2170_v7   ;;  %v2297_v30 = vld [vmem:[%s2984_s0 + $0xc8] sm:$0xff]  ;;  %v922_v31 = vld [vmem:[%s2987_s3 + $0x20] sm:$0xff]  ;;  %v924_v35 = vld [vmem:[%s2987_s3 + $0x30] sm:$0xff] }
   0xf   :  { %498 = vperm.xlu1 %1925, %v2155_v4   ;;  %1854 = vmatprep.subr.bf16.mxu0 %v1853_v24  ;;  %v923_v32 = vld [vmem:[%s2987_s3 + $0x28] sm:$0xff]  ;;  %v925_v36 = vld [vmem:[%s2987_s3 + $0x38] sm:$0xff]  ;;  %v926_v38 = vld [vmem:[%s2987_s3 + $0x40] sm:$0xff] }
  0x10   :  { %1856 = vmatpush3.bf16.msra.mxu0 %v1853_v24  ;;  %v1861_v33 = vpack.c.bf16 %v923_v32, %v922_v31  ;;  %v1865_v37 = vpack.c.bf16 %v925_v36, %v924_v35  ;;  %v927_v39 = vld [vmem:[%s2987_s3 + $0x48] sm:$0xff]  ;;  %v928_v41 = vld [vmem:[%s2987_s3 + $0x50] sm:$0xff]  ;;  %v929_v42 = vld [vmem:[%s2987_s3 + $0x58] sm:$0xff] }
  0x11   :  { %1858 = vmatprep.subr.bf16.mxu0 %v1857_v29  ;;  %v1869_v40 = vpack.c.bf16 %v927_v39, %v926_v38  ;;  %v1873_v43 = vpack.c.bf16 %v929_v42, %v928_v41  ;;  %v930_v44 = vld [vmem:[%s2987_s3 + $0x60] sm:$0xff]  ;;  %v931_v45 = vld [vmem:[%s2987_s3 + $0x68] sm:$0xff]  ;;  %v37_v46 = vld [vmem:[%s2984_s0 + $0x50] sm:$0xff] }
  0x12   :  { %353 = vperm.xlu0 %1926, %v2177_v8   ;;  %v1877_v47 = vpack.c.bf16 %v931_v45, %v930_v44  ;;  %v932_v48 = vld [vmem:[%s2987_s3 + $0x70] sm:$0xff]  ;;  %v933_v49 = vld [vmem:[%s2987_s3 + $0x78] sm:$0xff]  ;;  %v2395_v59 = vld [vmem:[%s2984_s0 + $0xe8] sm:$0xff] }
  0x13   :  { %1927 = vset.pattern.permute.xlu1 %v2996_v9  ;;  %v1881_v50 = vpack.c.bf16 %v933_v49, %v932_v48  ;;  %v2405_v61 = vld [vmem:[%s2984_s0 + $0xf0] sm:$0xff]  ;;  %v2516_v48 = vld [vmem:[%s2985_s1 + $0x1] ss:$0 sm:$0xff]  ;;  %v2521_v49 = vld [vmem:[%s2985_s1] ss:$0 sm:$0xff] }
  0x14   :  { %691 = vperm.xlu1 %1927, %v2141_v1   ;;  %1860 = vmatpush3.bf16.msra.mxu0 %v1857_v29  ;;  %3002 = vst [vmem:[#allocation5_spill] sm:$0xff] %v2405_v61 }
  0x15   :  { %1862 = vmatprep.subr.bf16.mxu0 %v1861_v33 }
  0x16   :  { %1951 = vset.pattern.permute.xlu0 %v2998_v6 }
  0x17   :  { %514 = vperm.xlu0 %1951, %v2185_v10  }
  0x18   :  { %1928 = vset.pattern.permute.xlu1 %v2992_v2  ;;  %1864 = vmatpush3.bf16.msra.mxu0 %v1861_v33 }
  0x19   :  { %309 = vperm.xlu1 %1928, %v2191_v11   ;;  %1866 = vmatprep.subr.bf16.mxu0 %v1865_v37 }
  0x1b   :  { %518 = vperm.xlu0 %1951, %v2198_v12  }
  0x1c   :  { %1868 = vmatpush3.bf16.msra.mxu0 %v1865_v37 }
  0x1d   :  { %1929 = vset.pattern.permute.xlu1 %v2994_v15  ;;  %1870 = vmatprep.subr.bf16.mxu0 %v1869_v40 }
  0x1e   :  { %89 = vperm.xlu1 %1929, %v31_v13  }
  0x1f   :  { %538 = vperm.xlu0 %1951, %v2208_v14  }
  0x20   :  { %1872 = vmatpush3.bf16.msra.mxu0 %v1869_v40 }
  0x21   :  { %1874 = vmatprep.subr.bf16.mxu0 %v1873_v43 }
  0x22   :  { %1930 = vset.pattern.permute.xlu1 %v2998_v6 }
  0x23   :  { %542 = vperm.xlu0 %1951, %v2215_v16   ;;  %502 = vperm.xlu1 %1930, %v2136_v0  }
  0x24   :  { %1876 = vmatpush3.bf16.msra.mxu0 %v1873_v43 }
  0x25   :  { %1878 = vmatprep.subr.bf16.mxu0 %v1877_v47 }
  0x27   :  { %562 = vperm.xlu0 %1951, %v2223_v17   ;;  %506 = vperm.xlu1 %1930, %v2191_v11  }
  0x28   :  { %1880 = vmatpush3.bf16.msra.mxu0 %v1877_v47 }
  0x29   :  { %1882 = vmatprep.subr.bf16.mxu0 %v1881_v50 }
  0x2b   :  { %566 = vperm.xlu0 %1951, %v2230_v18   ;;  %1931 = vset.pattern.permute.xlu1 %v2992_v2 }
  0x2c   :  { %313 = vperm.xlu1 %1931, %v31_v13   ;;  %1884 = vmatpush3.bf16.msra.mxu0 %v1881_v50 }
  0x2f   :  { %586 = vperm.xlu0 %1951, %v2237_v19  }
  0x30   :  { %317 = vperm.xlu1 %1931, %v2185_v10  }
  0x33   :  { %590 = vperm.xlu0 %1951, %v2244_v20  }
  0x34   :  { %1932 = vset.pattern.permute.xlu1 %v2996_v9 }
  0x35   :  { %703 = vperm.xlu1 %1932, %v2191_v11  }
  0x37   :  { %1975 = vset.pattern.permute.xlu0 %v2996_v9 }
  0x38   :  { %695 = vperm.xlu0 %1975, %v2155_v4  }
  0x39   :  { %1933 = vset.pattern.permute.xlu1 %v2998_v6 }
  0x3a   :  { %510 = vperm.xlu1 %1933, %v31_v13  }
  0x3c   :  { %699 = vperm.xlu0 %1975, %v2136_v0  }
  0x3e   :  { %1934 = vset.pattern.permute.xlu1 %v2994_v15 }
  0x3f   :  { %104 = vperm.xlu1 %1934, %v2150_v3  }
  0x40   :  { %719 = vperm.xlu0 %1975, %v2150_v3  }
  0x43   :  { %1935 = vset.pattern.permute.xlu1 %v2992_v2 }
  0x44   :  { %723 = vperm.xlu0 %1975, %v2162_v5   ;;  %321 = vperm.xlu1 %1935, %v2198_v12  }
  0x48   :  { %743 = vperm.xlu0 %1975, %v2170_v7   ;;  %1936 = vset.pattern.permute.xlu1 %v2996_v9 }
  0x49   :  { %707 = vperm.xlu1 %1936, %v31_v13  }
  0x4c   :  { %747 = vperm.xlu0 %1975, %v2177_v8  }
  0x4d   :  { %711 = vperm.xlu1 %1936, %v2185_v10  }
  0x50   :  { %767 = vperm.xlu0 %1975, %v2266_v21  }
  0x51   :  { %1937 = vset.pattern.permute.xlu1 %v2994_v15 }
  0x52   :  { %109 = vperm.xlu1 %1937, %v2162_v5  }
  0x54   :  { %771 = vperm.xlu0 %1975, %v2279_v25  }
  0x56   :  { %114 = vperm.xlu1 %1937, %v2291_v28  }
  0x58   :  { %791 = vperm.xlu0 %1975, %v2297_v30  }
  0x5a   :  { %1938 = vset.pattern.permute.xlu1 %v2998_v6 }
  0x5b   :  { %522 = vperm.xlu1 %1938, %v2150_v3  }
  0x5c   :  { %795 = vperm.xlu0 %1975, %v2310_v34  }
  0x5f   :  { %1939 = vset.pattern.permute.xlu1 %v2996_v9 }
  0x60   :  { %1982 = vset.pattern.permute.xlu0 %v2994_v15  ;;  %715 = vperm.xlu1 %1939, %v2198_v12  }
  0x61   :  { %69 = vperm.xlu0 %1982, %v2141_v1  }
  0x64   :  { %1940 = vset.pattern.permute.xlu1 %v2992_v2 }
  0x65   :  { %74 = vperm.xlu0 %1982, %v2155_v4   ;;  %333 = vperm.xlu1 %1940, %v2291_v28  }
  0x69   :  { %79 = vperm.xlu0 %1982, %v2136_v0   ;;  %1941 = vset.pattern.permute.xlu1 %v2994_v15 }
  0x6a   :  { %119 = vperm.xlu1 %1941, %v37_v46  }
  0x6d   :  { %84 = vperm.xlu0 %1982, %v2191_v11  }
  0x6e   :  { %1942 = vset.pattern.permute.xlu1 %v2998_v6 }
  0x6f   :  { %526 = vperm.xlu1 %1942, %v2162_v5   ;;  %v42_v5 = vld [vmem:[%s2984_s0 + $0x78] sm:$0xff] }
  0x71   :  { %94 = vperm.xlu0 %1982, %v2185_v10  }
  0x73   :  { %530 = vperm.xlu1 %1942, %v2291_v28  }
  0x75   :  { %99 = vperm.xlu0 %1982, %v2198_v12  }
  0x77   :  { %1943 = vset.pattern.permute.xlu1 %v2992_v2 }
  0x78   :  { %337 = vperm.xlu1 %1943, %v37_v46  }
  0x79   :  { %124 = vperm.xlu0 %1982, %v2208_v14  }
  0x7c   :  { %341 = vperm.xlu1 %1943, %v2208_v14  }
  0x7d   :  { %129 = vperm.xlu0 %1982, %v2215_v16  }
  0x80   :  { %1944 = vset.pattern.permute.xlu1 %v2996_v9 }
  0x81   :  { %727 = vperm.xlu1 %1944, %v2291_v28   ;;  %v2369_v51 = vpop.permute.xlu1 %297  ;;  %v2371_v52 = vpop.permute.xlu0 %305  ;;  %154 = vperm.xlu0 %1982, %v2223_v17  }
  0x85   :  { %1945 = vset.pattern.permute.xlu1 %v2998_v6  ;;  %v2375_v53 = vpop.permute.xlu1 %301  ;;  %v2377_v54 = vpop.permute.xlu0 %325  ;;  %159 = vperm.xlu0 %1982, %v2230_v18  }
  0x86   :  { %534 = vperm.xlu1 %1945, %v37_v46  }
  0x89   :  { %v2380_v55 = vpop.permute.xlu0 %329  ;;  %184 = vperm.xlu0 %1982, %v2237_v19  }
  0x8a   :  { %1946 = vset.pattern.permute.xlu1 %v2994_v15  ;;  %v2384_v56 = vpop.permute.xlu1 %494 }
  0x8b   :  { %134 = vperm.xlu1 %1946, %v2170_v7  }
  0x8d   :  { %v2387_v57 = vpop.permute.xlu0 %349  ;;  %189 = vperm.xlu0 %1982, %v2244_v20  }
  0x8e   :  { %v2390_v58 = vpop.permute.xlu1 %498 }
  0x8f   :  { %1947 = vset.pattern.permute.xlu1 %v2992_v2 }
  0x90   :  { %345 = vperm.xlu1 %1947, %v2215_v16  }
  0x91   :  { %v2399_v60 = vpop.permute.xlu0 %353  ;;  %214 = vperm.xlu0 %1982, %v2395_v59  }
  0x93   :  { %v2407_v62 = vpop.permute.xlu1 %691 }
  0x94   :  { %1948 = vset.pattern.permute.xlu1 %v2996_v9 }
  0x95   :  { %731 = vperm.xlu1 %1948, %v37_v46   ;;  %219 = vperm.xlu0 %1982, %v2405_v61   ;;  %v2508_v46 = vld [vmem:[%s2984_s0 + $0xf8] sm:$0xff]  ;;  %v430_v61 = vmul.f32 %v2516_v48, %v2371_v52 }
  0x96   :  { %v2411_v63 = vpop.permute.xlu0 %514 }
  0x98   :  { %v2413_v0 = vpop.permute.xlu1 %309 }
  0x99   :  { %735 = vperm.xlu1 %1948, %v2208_v14   ;;  %1984 = vset.pattern.permute.xlu0 %v2992_v2 }
  0x9a   :  { %v2417_v1 = vpop.permute.xlu0 %518  ;;  %373 = vperm.xlu0 %1984, %v2266_v21  }
  0x9d   :  { %1949 = vset.pattern.permute.xlu1 %v2994_v15  ;;  %v2421_v3 = vpop.permute.xlu1 %89 }
  0x9e   :  { %139 = vperm.xlu1 %1949, %v2177_v8   ;;  %v2424_v4 = vpop.permute.xlu0 %538  ;;  %377 = vperm.xlu0 %1984, %v2279_v25  }
  0xa2   :  { %144 = vperm.xlu1 %1949, %v42_v5   ;;  %v2430_v10 = vpop.permute.xlu1 %502  ;;  %v2432_v11 = vpop.permute.xlu0 %542  ;;  %397 = vperm.xlu0 %1984, %v2297_v30  }
  0xa6   :  { %1950 = vset.pattern.permute.xlu1 %v2998_v6  ;;  %v2436_v12 = vpop.permute.xlu1 %506  ;;  %v2438_v13 = vpop.permute.xlu0 %562  ;;  %401 = vperm.xlu0 %1984, %v2310_v34  }
  0xa7   :  { %546 = vperm.xlu1 %1950, %v2170_v7   ;;  %v43_v7 = vld [vmem:[%s2984_s0 + $0x80] sm:$0xff] }
  0xaa   :  { %v2442_v14 = vpop.permute.xlu0 %566  ;;  %421 = vperm.xlu0 %1984, %v2508_v46  }
  0xab   :  { %3003 = vst [vmem:[#allocation6_spill] sm:$0xff] %v2442_v14  ;;  %1952 = vset.pattern.permute.xlu1 %v2996_v9  ;;  %v2445_v22 = vpop.permute.xlu1 %313 }
  0xac   :  { %739 = vperm.xlu1 %1952, %v2215_v16  }
  0xae   :  { %v2448_v23 = vpop.permute.xlu0 %586  ;;  %1989 = vset.pattern.permute.xlu0 %v2998_v6 }
  0xaf   :  { %3004 = vst [vmem:[#allocation7_spill] sm:$0xff] %v2448_v23  ;;  %v2450_v24 = vpop.permute.xlu1 %317  ;;  %610 = vperm.xlu0 %1989, %v2395_v59  }
  0xb0   :  { %1953 = vset.pattern.permute.xlu1 %v2992_v2 }
  0xb1   :  { %357 = vperm.xlu1 %1953, %v42_v5  }
  0xb2   :  { %v2453_v26 = vpop.permute.xlu0 %590 }
  0xb3   :  { %3005 = vst [vmem:[#allocation8_spill] sm:$0xff] %v2453_v26  ;;  %618 = vperm.xlu0 %1989, %v2508_v46  }
  0xb4   :  { %v2458_v27 = vpop.permute.xlu1 %703 }
  0xb5   :  { %1954 = vset.pattern.permute.xlu1 %v2994_v15 }
  0xb6   :  { %149 = vperm.xlu1 %1954, %v43_v7  }
  0xb7   :  { %v696_v28 = vpop.permute.xlu0 %695 }
  0xb9   :  { %v2461_v16 = vpop.permute.xlu1 %510 }
  0xba   :  { %1955 = vset.pattern.permute.xlu1 %v2998_v6 }
  0xbb   :  { %550 = vperm.xlu1 %1955, %v2177_v8   ;;  %v2465_v29 = vpop.permute.xlu0 %699 }
  0xbe   :  { %v2467_v31 = vpop.permute.xlu1 %104 }
  0xbf   :  { %554 = vperm.xlu1 %1955, %v42_v5   ;;  %v2469_v32 = vpop.permute.xlu0 %719 }
  0xc3   :  { %1956 = vset.pattern.permute.xlu1 %v2992_v2  ;;  %v2472_v33 = vpop.permute.xlu1 %321  ;;  %v2474_v35 = vpop.permute.xlu0 %723 }
  0xc4   :  { %361 = vperm.xlu1 %1956, %v43_v7  }
  0xc7   :  { %v2476_v36 = vpop.permute.xlu0 %743 }
  0xc8   :  { %365 = vperm.xlu1 %1956, %v2223_v17   ;;  %v2479_v37 = vpop.permute.xlu1 %707 }
  0xcb   :  { %v2481_v8 = vpop.permute.xlu0 %747 }
  0xcc   :  { %1957 = vset.pattern.permute.xlu1 %v2996_v9  ;;  %v2484_v38 = vpop.permute.xlu1 %711 }
  0xcd   :  { %751 = vperm.xlu1 %1957, %v42_v5  }
  0xcf   :  { %v2486_v39 = vpop.permute.xlu0 %767 }
  0xd0   :  { %3006 = vst [vmem:[#allocation9_spill] sm:$0xff] %v2486_v39 }
  0xd1   :  { %1958 = vset.pattern.permute.xlu1 %v2998_v6  ;;  %v2489_v40 = vpop.permute.xlu1 %109 }
  0xd2   :  { %558 = vperm.xlu1 %1958, %v43_v7  }
  0xd3   :  { %v2491_v41 = vpop.permute.xlu0 %771 }
  0xd4   :  { %3007 = vst [vmem:[#allocation10_spill] sm:$0xff] %v2491_v41 }
  0xd5   :  { %v2493_v42 = vpop.permute.xlu1 %114 }
  0xd6   :  { %1959 = vset.pattern.permute.xlu1 %v2994_v15  ;;  %v2533_v15 = vld [vmem:[%s2986_s2] ss:$0 sm:$0xff] }
  0xd7   :  { %164 = vperm.xlu1 %1959, %v2266_v21   ;;  %v2497_v43 = vpop.permute.xlu0 %791 }
  0xd8   :  { %3008 = vst [vmem:[#allocation11_spill] sm:$0xff] %v2497_v43 }
  0xda   :  { %v2499_v44 = vpop.permute.xlu1 %522 }
  0xdb   :  { %1960 = vset.pattern.permute.xlu1 %v2992_v2  ;;  %v2502_v45 = vpop.permute.xlu0 %795  ;;  %v2528_v2 = vld [vmem:[%s2985_s1 + $0x2] ss:$0 sm:$0xff] }
  0xdc   :  { %3009 = vst [vmem:[#allocation12_spill] sm:$0xff] %v2502_v45  ;;  %369 = vperm.xlu1 %1960, %v2230_v18   ;;  %v428_v45 = vmul.f32 %v2516_v48, %v2369_v51  ;;  %v625_v26 = vmul.f32 %v2528_v2, %v2384_v56  ;;  %v626_v56 = vmul.f32 %v2528_v2, %v2390_v58  ;;  %v2573_v58 = vld [vmem:[%s2984_s0 + $0xa8] sm:$0xff] }
  0xdf   :  { %v2511_v47 = vpop.permute.xlu1 %715 }
  0xe0   :  { %v70_v50 = vpop.permute.xlu0 %69  ;;  %1961 = vset.pattern.permute.xlu1 %v2996_v9 }
  0xe1   :  { %v231_v5 = vmul.f32 %v2521_v49, %v70_v50  ;;  %755 = vperm.xlu1 %1961, %v43_v7   ;;  %v2543_v7 = vld [vmem:[%s2985_s1 + $0x3] ss:$0 sm:$0xff] }
  0xe2   :  { %v822_v23 = vmul.f32 %v2543_v7, %v2407_v62 }
  0xe3   :  { %v263_v9 = vadd.f32 %v2533_v15, %v231_v5  ;;  %v429_v5 = vmul.f32 %v2516_v48, %v2375_v53 }
  0xe4   :  { %v75_v50 = vpop.permute.xlu0 %74  ;;  %v2545_v43 = vpop.permute.xlu1 %333 }
  0xe5   :  { %v232_v6 = vmul.f32 %v2521_v49, %v75_v50  ;;  %759 = vperm.xlu1 %1961, %v2223_v17   ;;  %v460_v51 = vadd.f32 %v428_v45, %v263_v9  ;;  %v823_v9 = vmul.f32 %v2543_v7, %v696_v28  ;;  %v3010_v45 = vmov 0  }
  0xe7   :  { %v264_v41 = vadd.f32 %v2533_v15, %v232_v6  ;;  %v657_v39 = vadd.f32 %v625_v26, %v460_v51  ;;  %v235_v26 = vmul.f32 %v2521_v49, %v2421_v3  ;;  %v432_v3 = vmul.f32 %v2516_v48, %v2445_v22 }
  0xe8   :  { %v80_v50 = vpop.permute.xlu0 %79  ;;  %v238_v22 = vmul.f32 %v2521_v49, %v2467_v31  ;;  %v826_v31 = vmul.f32 %v2543_v7, %v2479_v37 }
  0xe9   :  { %v461_v17 = vadd.f32 %v429_v5, %v264_v41  ;;  %v233_v53 = vmul.f32 %v2521_v49, %v80_v50  ;;  %1962 = vset.pattern.permute.xlu1 %v3010_v45  ;;  %v2564_v62 = vpop.permute.xlu1 %119  ;;  %v854_v6 = vadd.f32 %v822_v23, %v657_v39  ;;  %v3011_v41 = vmov 3  }
  0xea   :  { %169 = vperm.xlu1 %1962, %v2279_v25   ;;  %1992 = vset.pattern.permute.xlu0 %v3011_v41  ;;  %v435_v5 = vmul.f32 %v2516_v48, %v2377_v54  ;;  %v627_v23 = vmul.f32 %v2528_v2, %v2430_v10  ;;  %v824_v50 = vmul.f32 %v2543_v7, %v2465_v29 }
  0xeb   :  { %v265_v52 = vadd.f32 %v2533_v15, %v233_v53  ;;  %v886_v51 = vmax.f32 %v854_v6, 0.0  ;;  %v658_v28 = vadd.f32 %v626_v56, %v461_v17  ;;  %v431_v17 = vmul.f32 %v2516_v48, %v2413_v0 }
  0xec   :  { %v85_v39 = vpop.permute.xlu0 %84  ;;  %v267_v54 = vadd.f32 %v2533_v15, %v235_v26  ;;  %v629_v10 = vmul.f32 %v2528_v2, %v2461_v16  ;;  %v436_v0 = vmul.f32 %v2516_v48, %v2380_v55  ;;  %v630_v26 = vmul.f32 %v2528_v2, %v2411_v63 }
  0xed   :  { %v462_v53 = vadd.f32 %v430_v61, %v265_v52  ;;  %v234_v6 = vmul.f32 %v2521_v49, %v85_v39  ;;  %1725 = vmatprep.mubr.f32.mxu0 %v886_v51  ;;  %v855_v56 = vadd.f32 %v823_v9, %v658_v28  ;;  %v239_v61 = vmul.f32 %v2521_v49, %v2489_v40 }
  0xee   :  { %174 = vperm.xlu1 %1962, %v2573_v58   ;;  %v527_v14 = vpop.permute.xlu1 %526  ;;  %v464_v16 = vadd.f32 %v432_v3, %v267_v54  ;;  %v628_v28 = vmul.f32 %v2528_v2, %v2436_v12  ;;  %v825_v55 = vmul.f32 %v2543_v7, %v2458_v27  ;;  %v270_v3 = vadd.f32 %v2533_v15, %v238_v22 }
  0xef   :  { %v266_v29 = vadd.f32 %v2533_v15, %v234_v6  ;;  %v887_v9 = vmax.f32 %v855_v56, 0.0  ;;  %v659_v52 = vadd.f32 %v627_v23, %v462_v53  ;;  %v433_v23 = vmul.f32 %v2516_v48, %v2450_v24 }
  0xf0   :  { %v95_v51 = vpop.permute.xlu0 %94  ;;  %v661_v63 = vadd.f32 %v629_v10, %v464_v16  ;;  %v3012_v53 = vmov 2   ;;  %v271_v56 = vadd.f32 %v2533_v15, %v239_v61  ;;  %v632_v24 = vmul.f32 %v2528_v2, %v2499_v44 }
  0xf1   :  { %v463_v39 = vadd.f32 %v431_v17, %v266_v29  ;;  %v236_v40 = vmul.f32 %v2521_v49, %v95_v51  ;;  %1726 = vmatmul.mubr.f32.vlgmr.msra.gmra.mrb[0].mxu0 %v887_v9  ;;  %v856_v6 = vadd.f32 %v824_v50, %v659_v52  ;;  %v633_v27 = vmul.f32 %v2528_v2, %v527_v14 }
  0xf2   :  { %1963 = vset.pattern.permute.xlu1 %v3012_v53  ;;  %v531_v37 = vpop.permute.xlu1 %530  ;;  %v858_v54 = vadd.f32 %v826_v31, %v661_v63  ;;  %v631_v61 = vmul.f32 %v2528_v2, %v2417_v1  ;;  %v827_v52 = vmul.f32 %v2543_v7, %v2484_v38  ;;  %v467_v16 = vadd.f32 %v435_v5, %v270_v3 }
  0xf3   :  { %v268_v12 = vadd.f32 %v2533_v15, %v236_v40  ;;  %570 = vperm.xlu1 %1963, %v2266_v21   ;;  %v888_v17 = vmax.f32 %v856_v6, 0.0  ;;  %v660_v50 = vadd.f32 %v628_v28, %v463_v39  ;;  %v434_v21 = vmul.f32 %v2516_v48, %v2472_v33 }
  0xf4   :  { %v100_v29 = vpop.permute.xlu0 %99  ;;  %v468_v31 = vadd.f32 %v436_v0, %v271_v56  ;;  %v829_v39 = vmul.f32 %v2543_v7, %v2469_v32  ;;  %v240_v1 = vmul.f32 %v2521_v49, %v2493_v42  ;;  %v664_v40 = vadd.f32 %v632_v24, %v467_v16 }
  0xf5   :  { %v465_v10 = vadd.f32 %v433_v23, %v268_v12  ;;  %v237_v22 = vmul.f32 %v2521_v49, %v100_v29  ;;  %1728 = vmatprep.mubr.f32.mxu0 %v888_v17  ;;  %v857_v9 = vadd.f32 %v825_v55, %v660_v50  ;;  %v890_v33 = vmax.f32 %v858_v54, 0.0 }
  0xf6   :  { %v830_v38 = vmul.f32 %v2543_v7, %v2474_v35  ;;  %v665_v5 = vadd.f32 %v633_v27, %v468_v31  ;;  %v437_v32 = vmul.f32 %v2516_v48, %v2545_v43  ;;  %v3013_v63 = vmov 1   ;;  %v2644_v43 = vld [vmem:[%s2984_s0 + $0xb0] sm:$0xff] }
  0xf7   :  { %v269_v44 = vadd.f32 %v2533_v15, %v237_v22  ;;  %1964 = vset.pattern.permute.xlu1 %v3011_v41  ;;  %v338_v14 = vpop.permute.xlu1 %337  ;;  %v889_v51 = vmax.f32 %v857_v9, 0.0  ;;  %v662_v28 = vadd.f32 %v630_v26, %v465_v10  ;;  %v828_v26 = vmul.f32 %v2543_v7, %v2511_v47 }
  0xf8   :  { %763 = vperm.xlu1 %1964, %v2230_v18   ;;  %v272_v18 = vadd.f32 %v2533_v15, %v240_v1  ;;  %v861_v3 = vadd.f32 %v829_v39, %v664_v40  ;;  %v634_v35 = vmul.f32 %v2528_v2, %v531_v37  ;;  %v862_v12 = vadd.f32 %v830_v38, %v665_v5  ;;  %v125_v9 = vpop.permute.xlu0 %124 }
  0xf9   :  { %v466_v0 = vadd.f32 %v434_v21, %v269_v44  ;;  %1729 = vmatmul.mubr.f32.gmra.mrb[2].mxu0 %v889_v51  ;;  %v859_v6 = vadd.f32 %v827_v52, %v662_v28  ;;  %v241_v21 = vmul.f32 %v2521_v49, %v2564_v62  ;;  %v242_v52 = vmul.f32 %v2521_v49, %v125_v9 }
  0xfa   :  { %1731 = vmatprep.mubr.f32.mxu0 %v890_v33  ;;  %v469_v17 = vadd.f32 %v437_v32, %v272_v18  ;;  %v893_v54 = vmax.f32 %v861_v3, 0.0  ;;  %v894_v37 = vmax.f32 %v862_v12, 0.0  ;;  %v438_v16 = vmul.f32 %v2516_v48, %v338_v14 }
  0xfb   :  { %v342_v23 = vpop.permute.xlu1 %341  ;;  %v891_v42 = vmax.f32 %v859_v6, 0.0  ;;  %v663_v55 = vadd.f32 %v631_v61, %v466_v0  ;;  %v273_v44 = vadd.f32 %v2533_v15, %v241_v21  ;;  %v636_v14 = vmul.f32 %v2528_v2, %v2424_v4  ;;  %v1201_v21 = vld [vmem:[%s2989_s5 + $0x18] sm:$0xff] }
  0xfc   :  { %1965 = vset.pattern.permute.xlu1 %v3013_v63  ;;  %v666_v24 = vadd.f32 %v634_v35, %v469_v17  ;;  %v439_v51 = vmul.f32 %v2516_v48, %v342_v23  ;;  %v130_v23 = vpop.permute.xlu0 %129 }
  0xfd   :  { %381 = vperm.xlu1 %1965, %v2573_v58   ;;  %1732 = vmatmul.mubr.f32.gmra.mrb[4].mxu0 %v891_v42  ;;  %v860_v56 = vadd.f32 %v828_v26, %v663_v55  ;;  %v470_v39 = vadd.f32 %v438_v16, %v273_v44  ;;  %v243_v18 = vmul.f32 %v2521_v49, %v130_v23 }
  0xff   :  { %v892_v47 = vmax.f32 %v860_v56, 0.0  ;;  %v275_v56 = vadd.f32 %v2533_v15, %v243_v18 }
 0x100   :  { %v728_v50 = vpop.permute.xlu1 %727 }
 0x101   :  { %v831_v29 = vmul.f32 %v2543_v7, %v728_v50  ;;  %1966 = vset.pattern.permute.xlu1 %v3010_v45  ;;  %1734 = vmatprep.mubr.f32.mxu0 %v892_v47  ;;  %v835_v47 = vmul.f32 %v2543_v7, %v2476_v36  ;;  %v1199_v36 = vld [vmem:[%s2989_s5 + $0x8] sm:$0xff] }
 0x102   :  { %179 = vperm.xlu1 %1966, %v2644_v43   ;;  %1735 = vmatmul.mubr.f32.gmra.mrb[6].mxu0 %v893_v54 }
 0x103   :  { %v863_v27 = vadd.f32 %v831_v29, %v666_v24  ;;  %1737 = vmatprep.mubr.f32.mxu0 %v894_v37  ;;  %v1198_v37 = vld [vmem:[%s2989_s5] sm:$0xff] }
 0x105   :  { %v535_v10 = vpop.permute.xlu1 %534  ;;  %v895_v22 = vmax.f32 %v863_v27, 0.0  ;;  %v1885_v27 = vpack.c.bf16 %v1199_v36, %v1198_v37  ;;  %v155_v37 = vpop.permute.xlu0 %154 }
 0x106   :  { %1967 = vset.pattern.permute.xlu1 %v3012_v53  ;;  %v635_v28 = vmul.f32 %v2528_v2, %v535_v10 }
 0x107   :  { %574 = vperm.xlu1 %1967, %v2279_v25   ;;  %1738 = vmatmul.mubr.f32.gmra.mrb[8].mxu0 %v895_v22  ;;  %v274_v25 = vadd.f32 %v2533_v15, %v242_v52 }
 0x108   :  { %v667_v40 = vadd.f32 %v635_v28, %v470_v39  ;;  %1886 = vmatprep.subr.bf16.mxu1 %v1885_v27 }
 0x109   :  { %v471_v1 = vadd.f32 %v439_v51, %v274_v25  ;;  %1888 = vmatpush3.bf16.msra.mxu1 %v1885_v27  ;;  %v1203_v51 = vld [vmem:[%s2989_s5 + $0x28] sm:$0xff]  ;;  %v2772_v27 = vld [vmem:[%s2984_s0 + $0xe0] sm:$0xff] }
 0x10a   :  { %v135_v61 = vpop.permute.xlu1 %134 }
 0x10b   :  { %578 = vperm.xlu1 %1967, %v2573_v58   ;;  %v668_v0 = vadd.f32 %v636_v14, %v471_v1  ;;  %v244_v55 = vmul.f32 %v2521_v49, %v135_v61  ;;  %v1205_v14 = vld [vmem:[%s2989_s5 + $0x38] sm:$0xff] }
 0x10d   :  { %v276_v35 = vadd.f32 %v2533_v15, %v244_v55  ;;  %v1209_v55 = vld [vmem:[%s2989_s5 + $0x58] sm:$0xff] }
 0x10f   :  { %1968 = vset.pattern.permute.xlu1 %v3013_v63  ;;  %v346_v31 = vpop.permute.xlu1 %345 }
 0x110   :  { %385 = vperm.xlu1 %1968, %v2644_v43   ;;  %v440_v12 = vmul.f32 %v2516_v48, %v346_v31 }
 0x112   :  { %v472_v24 = vadd.f32 %v440_v12, %v275_v56  ;;  %v1210_v56 = vld [vmem:[%s2989_s5 + $0x60] sm:$0xff]  ;;  %v1211_v12 = vld [vmem:[%s2989_s5 + $0x68] sm:$0xff] }
 0x114   :  { %389 = vperm.xlu1 %1968, %v2237_v19   ;;  %v732_v62 = vpop.permute.xlu1 %731 }
 0x115   :  { %v832_v33 = vmul.f32 %v2543_v7, %v732_v62 }
 0x117   :  { %v864_v38 = vadd.f32 %v832_v33, %v667_v40  ;;  %v442_v40 = vmul.f32 %v2516_v48, %v2399_v60 }
 0x118   :  { %1969 = vset.pattern.permute.xlu1 %v3011_v41  ;;  %v736_v5 = vpop.permute.xlu1 %735 }
 0x119   :  { %v833_v6 = vmul.f32 %v2543_v7, %v736_v5  ;;  %775 = vperm.xlu1 %1969, %v2573_v58   ;;  %v896_v26 = vmax.f32 %v864_v38, 0.0  ;;  %v441_v58 = vmul.f32 %v2516_v48, %v2387_v57  ;;  %v637_v57 = vmul.f32 %v2528_v2, %v2432_v11  ;;  %v1200_v11 = vld [vmem:[%s2989_s5 + $0x10] sm:$0xff]  ;;  %v2728_v38 = vld [vmem:[%s2984_s0 + $0xd8] sm:$0xff]  ;;  %v1206_v5 = vld [vmem:[%s2989_s5 + $0x40] sm:$0xff] }
 0x11a   :  { %v1889_v16 = vpack.c.bf16 %v1201_v21, %v1200_v11 }
 0x11b   :  { %v865_v32 = vadd.f32 %v833_v6, %v668_v0  ;;  %1740 = vmatprep.mubr.f32.mxu0 %v896_v26  ;;  %v473_v50 = vadd.f32 %v441_v58, %v276_v35  ;;  %v669_v9 = vadd.f32 %v637_v57, %v472_v24  ;;  %v1207_v0 = vld [vmem:[%s2989_s5 + $0x48] sm:$0xff]  ;;  %v836_v26 = vmul.f32 %v2543_v7, %v2481_v8 }
 0x11c   :  { %1890 = vmatprep.subr.bf16.mxu1 %v1889_v16  ;;  %v1901_v6 = vpack.c.bf16 %v1207_v0, %v1206_v5 }
 0x11d   :  { %1970 = vset.pattern.permute.xlu1 %v3012_v53  ;;  %v140_v4 = vpop.permute.xlu1 %139  ;;  %v897_v42 = vmax.f32 %v865_v32, 0.0  ;;  %1892 = vmatpush3.bf16.msra.mxu1 %v1889_v16 }
 0x11e   :  { %582 = vperm.xlu1 %1970, %v2644_v43   ;;  %v245_v39 = vmul.f32 %v2521_v49, %v140_v4 }
 0x11f   :  { %1741 = vmatmul.mubr.f32.gmra.mrb[10].mxu0 %v897_v42  ;;  %v1208_v42 = vld [vmem:[%s2989_s5 + $0x50] sm:$0xff] }
 0x120   :  { %v277_v33 = vadd.f32 %v2533_v15, %v245_v39  ;;  %v1905_v58 = vpack.c.bf16 %v1209_v55, %v1208_v42 }
 0x121   :  { %v2673_v3 = vpop.permute.xlu1 %144 }
 0x122   :  { %1971 = vset.pattern.permute.xlu1 %v3010_v45  ;;  %v474_v32 = vadd.f32 %v442_v40, %v277_v33  ;;  %v642_v33 = vmul.f32 %v2528_v2, %v2438_v13 }
 0x123   :  { %194 = vperm.xlu1 %1971, %v2297_v30  }
 0x126   :  { %v547_v17 = vpop.permute.xlu1 %546 }
 0x127   :  { %v638_v54 = vmul.f32 %v2528_v2, %v547_v17  ;;  %1972 = vset.pattern.permute.xlu1 %v3013_v63  ;;  %v1909_v17 = vpack.c.bf16 %v1211_v12, %v1210_v56 }
 0x128   :  { %393 = vperm.xlu1 %1972, %v2244_v20  }
 0x129   :  { %v670_v29 = vadd.f32 %v638_v54, %v473_v50  ;;  %v1212_v50 = vld [vmem:[%s2989_s5 + $0x70] sm:$0xff]  ;;  %v1213_v54 = vld [vmem:[%s2989_s5 + $0x78] sm:$0xff] }
 0x12a   :  { %v1913_v57 = vpack.c.bf16 %v1213_v54, %v1212_v50 }
 0x12b   :  { %v740_v10 = vpop.permute.xlu1 %739  ;;  %v867_v22 = vadd.f32 %v835_v47, %v670_v29 }
 0x12c   :  { %v834_v61 = vmul.f32 %v2543_v7, %v740_v10  ;;  %1973 = vset.pattern.permute.xlu1 %v3011_v41 }
 0x12d   :  { %779 = vperm.xlu1 %1973, %v2644_v43   ;;  %v899_v25 = vmax.f32 %v867_v22, 0.0  ;;  %v1202_v43 = vld [vmem:[%s2989_s5 + $0x20] sm:$0xff] }
 0x12e   :  { %v866_v52 = vadd.f32 %v834_v61, %v669_v9  ;;  %v1893_v28 = vpack.c.bf16 %v1203_v51, %v1202_v43  ;;  %v160_v61 = vpop.permute.xlu0 %159 }
 0x130   :  { %v898_v31 = vmax.f32 %v866_v52, 0.0  ;;  %v358_v44 = vpop.permute.xlu1 %357  ;;  %1894 = vmatprep.subr.bf16.mxu1 %v1893_v28 }
 0x131   :  { %783 = vperm.xlu1 %1973, %v2237_v19   ;;  %1896 = vmatpush3.bf16.msra.mxu1 %v1893_v28  ;;  %v1204_v19 = vld [vmem:[%s2989_s5 + $0x30] sm:$0xff]  ;;  %v443_v24 = vmul.f32 %v2516_v48, %v358_v44 }
 0x132   :  { %1743 = vmatprep.mubr.f32.mxu0 %v898_v31  ;;  %v1897_v1 = vpack.c.bf16 %v1205_v14, %v1204_v19  ;;  %v2779_v16 = vpop.permute.xlu0 %184 }
 0x133   :  { %1744 = vmatmul.mubr.f32.gmra.mrb[12].mxu0 %v899_v25  ;;  %v248_v25 = vmul.f32 %v2521_v49, %v155_v37  ;;  %v3016_v37 = vld [vmem:[#allocation9_spill] sm:$0xff] }
 0x134   :  { %1898 = vmatprep.subr.bf16.mxu1 %v1897_v1 }
 0x135   :  { %1974 = vset.pattern.permute.xlu1 %v3010_v45  ;;  %v2713_v62 = vpop.permute.xlu1 %149  ;;  %1900 = vmatpush3.bf16.msra.mxu1 %v1897_v1  ;;  %v280_v39 = vadd.f32 %v2533_v15, %v248_v25 }
 0x136   :  { %199 = vperm.xlu1 %1974, %v2310_v34   ;;  %1902 = vmatprep.subr.bf16.mxu1 %v1901_v6  ;;  %v247_v44 = vmul.f32 %v2521_v49, %v2713_v62  ;;  %v2785_v43 = vpop.permute.xlu0 %189 }
 0x139   :  { %1904 = vmatpush3.bf16.msra.mxu1 %v1901_v6 }
 0x13a   :  { %204 = vperm.xlu1 %1974, %v2728_v38   ;;  %v551_v60 = vpop.permute.xlu1 %550  ;;  %1906 = vmatprep.subr.bf16.mxu1 %v1905_v58  ;;  %v2794_v1 = vpop.permute.xlu0 %214 }
 0x13b   :  { %v639_v23 = vmul.f32 %v2528_v2, %v551_v60 }
 0x13d   :  { %v671_v4 = vadd.f32 %v639_v23, %v474_v32  ;;  %1908 = vmatpush3.bf16.msra.mxu1 %v1905_v58 }
 0x13e   :  { %1976 = vset.pattern.permute.xlu1 %v3012_v53  ;;  %v555_v18 = vpop.permute.xlu1 %554  ;;  %1910 = vmatprep.subr.bf16.mxu1 %v1909_v17  ;;  %v2803_v42 = vpop.permute.xlu0 %219 }
 0x13f   :  { %594 = vperm.xlu1 %1976, %v2297_v30   ;;  %v868_v8 = vadd.f32 %v836_v26, %v671_v4  ;;  %v246_v30 = vmul.f32 %v2521_v49, %v2673_v3  ;;  %v640_v3 = vmul.f32 %v2528_v2, %v555_v18 }
 0x141   :  { %v900_v35 = vmax.f32 %v868_v8, 0.0  ;;  %1912 = vmatpush3.bf16.msra.mxu1 %v1909_v17  ;;  %v249_v8 = vmul.f32 %v2521_v49, %v160_v61 }
 0x142   :  { %1914 = vmatprep.subr.bf16.mxu1 %v1913_v57 }
 0x143   :  { %1977 = vset.pattern.permute.xlu1 %v3011_v41  ;;  %1746 = vmatprep.mubr.f32.mxu0 %v900_v35  ;;  %v362_v47 = vpop.permute.xlu1 %361  ;;  %v374_v35 = vpop.permute.xlu0 %373  ;;  %v281_v17 = vadd.f32 %v2533_v15, %v249_v8 }
 0x144   :  { %787 = vperm.xlu1 %1977, %v2244_v20   ;;  %v278_v20 = vadd.f32 %v2533_v15, %v246_v30  ;;  %v444_v51 = vmul.f32 %v2516_v48, %v362_v47  ;;  %v447_v12 = vmul.f32 %v2516_v48, %v374_v35 }
 0x145   :  { %1916 = vmatpush3.bf16.msra.mxu1 %v1913_v57  ;;  %v3014_v57 = vld [vmem:[#allocation6_spill] sm:$0xff] }
 0x146   :  { %v475_v36 = vadd.f32 %v443_v24, %v278_v20  ;;  %v643_v24 = vmul.f32 %v2528_v2, %v3014_v57  ;;  %v841_v20 = vmul.f32 %v2543_v7, %v3016_v37 }
 0x147   :  { %v366_v29 = vpop.permute.xlu1 %365 }
 0x148   :  { %1978 = vset.pattern.permute.xlu1 %v3013_v63  ;;  %v672_v22 = vadd.f32 %v640_v3, %v475_v36  ;;  %v445_v19 = vmul.f32 %v2516_v48, %v366_v29  ;;  %v3015_v29 = vld [vmem:[#allocation5_spill] sm:$0xff] }
 0x149   :  { %405 = vperm.xlu1 %1978, %v2728_v38  }
 0x14a   :  { %v477_v5 = vadd.f32 %v445_v19, %v280_v39 }
 0x14c   :  { %v752_v10 = vpop.permute.xlu1 %751  ;;  %v674_v23 = vadd.f32 %v642_v33, %v477_v5 }
 0x14d   :  { %v837_v9 = vmul.f32 %v2543_v7, %v752_v10  ;;  %1979 = vset.pattern.permute.xlu1 %v3010_v45 }
 0x14e   :  { %209 = vperm.xlu1 %1979, %v2772_v27  }
 0x14f   :  { %v869_v11 = vadd.f32 %v837_v9, %v672_v22 }
 0x151   :  { %v901_v21 = vmax.f32 %v869_v11, 0.0  ;;  %v559_v52 = vpop.permute.xlu1 %558 }
 0x152   :  { %1980 = vset.pattern.permute.xlu1 %v3012_v53  ;;  %v641_v14 = vmul.f32 %v2528_v2, %v559_v52 }
 0x153   :  { %598 = vperm.xlu1 %1980, %v2310_v34   ;;  %1747 = vmatmul.mubr.f32.gmra.mrb[14].mxu0 %v901_v21  ;;  %v279_v34 = vadd.f32 %v2533_v15, %v247_v44 }
 0x155   :  { %v476_v62 = vadd.f32 %v444_v51, %v279_v34 }
 0x156   :  { %v165_v31 = vpop.permute.xlu1 %164 }
 0x157   :  { %602 = vperm.xlu1 %1980, %v2728_v38   ;;  %v673_v0 = vadd.f32 %v641_v14, %v476_v62  ;;  %v250_v58 = vmul.f32 %v2521_v49, %v165_v31  ;;  %v378_v31 = vpop.permute.xlu0 %377 }
 0x15b   :  { %1981 = vset.pattern.permute.xlu1 %v3013_v63  ;;  %v370_v28 = vpop.permute.xlu1 %369 }
 0x15c   :  { %409 = vperm.xlu1 %1981, %v2772_v27   ;;  %v446_v47 = vmul.f32 %v2516_v48, %v370_v28  ;;  %v3017_v28 = vld [vmem:[#allocation10_spill] sm:$0xff] }
 0x160   :  { %413 = vperm.xlu1 %1981, %v2395_v59   ;;  %v756_v40 = vpop.permute.xlu1 %755 }
 0x161   :  { %v838_v60 = vmul.f32 %v2543_v7, %v756_v40  ;;  %v254_v40 = vmul.f32 %v2521_v49, %v2779_v16 }
 0x163   :  { %v870_v6 = vadd.f32 %v838_v60, %v673_v0  ;;  %v286_v5 = vadd.f32 %v2533_v15, %v254_v40 }
 0x164   :  { %1983 = vset.pattern.permute.xlu1 %v3011_v41  ;;  %v760_v26 = vpop.permute.xlu1 %759 }
 0x165   :  { %v902_v32 = vmax.f32 %v870_v6, 0.0  ;;  %v839_v4 = vmul.f32 %v2543_v7, %v760_v26  ;;  %799 = vperm.xlu1 %1983, %v2728_v38   ;;  %v282_v38 = vadd.f32 %v2533_v15, %v250_v58 }
 0x167   :  { %v871_v55 = vadd.f32 %v839_v4, %v674_v23  ;;  %1749 = vmatprep.mubr.f32.mxu0 %v902_v32  ;;  %v479_v50 = vadd.f32 %v447_v12, %v282_v38  ;;  %v3018_v32 = vld [vmem:[#allocation7_spill] sm:$0xff]  ;;  %v255_v38 = vmul.f32 %v2521_v49, %v2785_v43 }
 0x168   :  { %v648_v23 = vmul.f32 %v2528_v2, %v3018_v32 }
 0x169   :  { %v903_v18 = vmax.f32 %v871_v55, 0.0  ;;  %1985 = vset.pattern.permute.xlu1 %v3012_v53  ;;  %v170_v13 = vpop.permute.xlu1 %169 }
 0x16a   :  { %606 = vperm.xlu1 %1985, %v2772_v27   ;;  %v251_v52 = vmul.f32 %v2521_v49, %v170_v13 }
 0x16b   :  { %1750 = vmatmul.mubr.f32.gmra.mrb[16].mxu0 %v903_v18 }
 0x16c   :  { %v283_v25 = vadd.f32 %v2533_v15, %v251_v52 }
 0x16d   :  { %v175_v56 = vpop.permute.xlu1 %174 }
 0x16e   :  { %1986 = vset.pattern.permute.xlu1 %v3010_v45  ;;  %v478_v45 = vadd.f32 %v446_v47, %v281_v17  ;;  %v252_v33 = vmul.f32 %v2521_v49, %v175_v56  ;;  %v287_v47 = vadd.f32 %v2533_v15, %v255_v38 }
 0x16f   :  { %224 = vperm.xlu1 %1986, %v2508_v46  }
 0x170   :  { %v675_v10 = vadd.f32 %v643_v24, %v478_v45  ;;  %v284_v26 = vadd.f32 %v2533_v15, %v252_v33  ;;  %v3019_v45 = vld [vmem:[#allocation8_spill] sm:$0xff] }
 0x172   :  { %v571_v30 = vpop.permute.xlu1 %570 }
 0x173   :  { %v644_v54 = vmul.f32 %v2528_v2, %v571_v30  ;;  %1987 = vset.pattern.permute.xlu1 %v3013_v63 }
 0x174   :  { %417 = vperm.xlu1 %1987, %v3015_v29  }
 0x175   :  { %v676_v3 = vadd.f32 %v644_v54, %v479_v50 }
 0x177   :  { %v764_v36 = vpop.permute.xlu1 %763  ;;  %v873_v9 = vadd.f32 %v841_v20, %v676_v3 }
 0x178   :  { %v840_v22 = vmul.f32 %v2543_v7, %v764_v36  ;;  %1988 = vset.pattern.permute.xlu1 %v3011_v41 }
 0x179   :  { %803 = vperm.xlu1 %1988, %v2772_v27   ;;  %v905_v21 = vmax.f32 %v873_v9, 0.0  ;;  %v448_v27 = vmul.f32 %v2516_v48, %v378_v31 }
 0x17a   :  { %v872_v63 = vadd.f32 %v840_v22, %v675_v10 }
 0x17b   :  { %v480_v34 = vadd.f32 %v448_v27, %v283_v25 }
 0x17c   :  { %v904_v61 = vmax.f32 %v872_v63, 0.0  ;;  %v382_v11 = vpop.permute.xlu1 %381 }
 0x17d   :  { %807 = vperm.xlu1 %1988, %v2395_v59   ;;  %v842_v59 = vmul.f32 %v2543_v7, %v3017_v28  ;;  %v449_v0 = vmul.f32 %v2516_v48, %v382_v11 }
 0x17e   :  { %1752 = vmatprep.mubr.f32.mxu0 %v904_v61 }
 0x17f   :  { %1753 = vmatmul.mubr.f32.gmra.mrb[18].mxu0 %v905_v21  ;;  %v481_v16 = vadd.f32 %v449_v0, %v284_v26 }
 0x181   :  { %1990 = vset.pattern.permute.xlu1 %v3012_v53  ;;  %v180_v44 = vpop.permute.xlu1 %179 }
 0x182   :  { %614 = vperm.xlu1 %1990, %v3015_v29   ;;  %v253_v17 = vmul.f32 %v2521_v49, %v180_v44  ;;  %v398_v44 = vpop.permute.xlu0 %397 }
 0x184   :  { %v285_v57 = vadd.f32 %v2533_v15, %v253_v17 }
 0x186   :  { %1991 = vset.pattern.permute.xlu1 %v3011_v41  ;;  %v575_v51 = vpop.permute.xlu1 %574 }
 0x187   :  { %v645_v39 = vmul.f32 %v2528_v2, %v575_v51  ;;  %811 = vperm.xlu1 %1991, %v3015_v29   ;;  %v649_v29 = vmul.f32 %v2528_v2, %v3019_v45  ;;  %v453_v51 = vmul.f32 %v2516_v48, %v398_v44 }
 0x189   :  { %v677_v19 = vadd.f32 %v645_v39, %v480_v34 }
 0x18a   :  { %v579_v53 = vpop.permute.xlu1 %578 }
 0x18b   :  { %815 = vperm.xlu1 %1991, %v2508_v46   ;;  %v874_v14 = vadd.f32 %v842_v59, %v677_v19  ;;  %v646_v46 = vmul.f32 %v2528_v2, %v579_v53  ;;  %v2869_v19 = vld [vmem:[%s2988_s4] ss:$0 sm:$0xff]  ;;  %v3020_v53 = vld [vmem:[#allocation11_spill] sm:$0xff] }
 0x18d   :  { %v906_v62 = vmax.f32 %v874_v14, 0.0  ;;  %v678_v13 = vadd.f32 %v646_v46, %v481_v16  ;;  %v847_v14 = vmul.f32 %v2543_v7, %v3020_v53 }
 0x18f   :  { %1755 = vmatprep.mubr.f32.mxu0 %v906_v62  ;;  %v386_v41 = vpop.permute.xlu1 %385 }
 0x190   :  { %v450_v30 = vmul.f32 %v2516_v48, %v386_v41 }
 0x192   :  { %v482_v20 = vadd.f32 %v450_v30, %v285_v57 }
 0x193   :  { %v390_v60 = vpop.permute.xlu1 %389 }
 0x194   :  { %v451_v6 = vmul.f32 %v2516_v48, %v390_v60 }
 0x196   :  { %v483_v4 = vadd.f32 %v451_v6, %v286_v5 }
 0x198   :  { %v776_v55 = vpop.permute.xlu1 %775  ;;  %v680_v18 = vadd.f32 %v648_v23, %v483_v4 }
 0x199   :  { %v843_v58 = vmul.f32 %v2543_v7, %v776_v55  ;;  %v402_v55 = vpop.permute.xlu0 %401 }
 0x19a   :  { %v454_v38 = vmul.f32 %v2516_v48, %v402_v55 }
 0x19b   :  { %v875_v8 = vadd.f32 %v843_v58, %v678_v13 }
 0x19d   :  { %v907_v35 = vmax.f32 %v875_v8, 0.0  ;;  %v583_v56 = vpop.permute.xlu1 %582 }
 0x19e   :  { %v647_v24 = vmul.f32 %v2528_v2, %v583_v56 }
 0x19f   :  { %1756 = vmatmul.mubr.f32.gmra.mrb[20].mxu0 %v907_v35 }
 0x1a0   :  { %v679_v36 = vadd.f32 %v647_v24, %v482_v20 }
 0x1a2   :  { %v195_v12 = vpop.permute.xlu1 %194 }
 0x1a3   :  { %v256_v31 = vmul.f32 %v2521_v49, %v195_v12 }
 0x1a5   :  { %v288_v27 = vadd.f32 %v2533_v15, %v256_v31 }
 0x1a7   :  { %v394_v50 = vpop.permute.xlu1 %393  ;;  %v485_v59 = vadd.f32 %v453_v51, %v288_v27 }
 0x1a8   :  { %v452_v54 = vmul.f32 %v2516_v48, %v394_v50 }
 0x1aa   :  { %v484_v37 = vadd.f32 %v452_v54, %v287_v47 }
 0x1ac   :  { %v780_v43 = vpop.permute.xlu1 %779  ;;  %v681_v3 = vadd.f32 %v649_v29, %v484_v37  ;;  %v3021_v37 = vld [vmem:[#allocation12_spill] sm:$0xff] }
 0x1ad   :  { %v844_v10 = vmul.f32 %v2543_v7, %v780_v43  ;;  %v848_v20 = vmul.f32 %v2543_v7, %v3021_v37 }
 0x1af   :  { %v876_v22 = vadd.f32 %v844_v10, %v679_v36 }
 0x1b0   :  { %v784_v9 = vpop.permute.xlu1 %783 }
 0x1b1   :  { %v908_v63 = vmax.f32 %v876_v22, 0.0  ;;  %v845_v61 = vmul.f32 %v2543_v7, %v784_v9 }
 0x1b3   :  { %v877_v11 = vadd.f32 %v845_v61, %v680_v18  ;;  %1758 = vmatprep.mubr.f32.mxu0 %v908_v63 }
 0x1b5   :  { %v909_v21 = vmax.f32 %v877_v11, 0.0  ;;  %v200_v52 = vpop.permute.xlu1 %199 }
 0x1b6   :  { %v257_v16 = vmul.f32 %v2521_v49, %v200_v52 }
 0x1b7   :  { %1759 = vmatmul.mubr.f32.gmra.mrb[22].mxu0 %v909_v21 }
 0x1b8   :  { %v289_v56 = vadd.f32 %v2533_v15, %v257_v16 }
 0x1b9   :  { %v2861_v25 = vpop.permute.xlu1 %204 }
 0x1ba   :  { %v486_v24 = vadd.f32 %v454_v38, %v289_v56 }
 0x1be   :  { %v595_v28 = vpop.permute.xlu1 %594 }
 0x1bf   :  { %v650_v34 = vmul.f32 %v2528_v2, %v595_v28 }
 0x1c1   :  { %v682_v39 = vadd.f32 %v650_v34, %v485_v59  ;;  %v258_v59 = vmul.f32 %v2521_v49, %v2861_v25  ;;  %v422_v25 = vpop.permute.xlu0 %421 }
 0x1c3   :  { %v788_v62 = vpop.permute.xlu1 %787  ;;  %v879_v0 = vadd.f32 %v847_v14, %v682_v39 }
 0x1c4   :  { %v846_v40 = vmul.f32 %v2543_v7, %v788_v62  ;;  %v1727_v41 = vpop.f32.mrb[0].mxu0  ;;  %v290_v62 = vadd.f32 %v2533_v15, %v258_v59 }
 0x1c5   :  { %v1013_v33 = vadd.f32 %v1727_v41, %v2869_v19  ;;  %v1007_v5 = vpop.f32.mrb[1].mxu0  ;;  %v911_v4 = vmax.f32 %v879_v0, 0.0 }
 0x1c6   :  { %v878_v60 = vadd.f32 %v846_v40, %v681_v3  ;;  %v1008_v6 = vadd.f32 %v2869_v19, %v1007_v5 }
 0x1c7   :  { %v1167_v23 = vmax.f32 %v1013_v33, 0.0 }
 0x1c8   :  { %v910_v26 = vmax.f32 %v878_v60, 0.0  ;;  %v406_v46 = vpop.permute.xlu1 %405  ;;  %v1166_v32 = vmax.f32 %v1008_v6, 0.0 }
 0x1c9   :  { %v455_v39 = vmul.f32 %v2516_v48, %v406_v46  ;;  %v2057_v48 = vld [vmem:[%s2985_s1] ss:$0 sm:$0xff] }
 0x1ca   :  { %1761 = vmatprep.mubr.f32.mxu0 %v910_v26  ;;  %1805 = vmatprep.mubr.f32.mxu1 %v1166_v32  ;;  %v2058_v32 = vld [vmem:[%s2985_s1 + $0x1] ss:$0 sm:$0xff] }
 0x1cb   :  { %1762 = vmatmul.mubr.f32.gmra.mrb[24].mxu0 %v911_v4  ;;  %1806 = vmatmul.mubr.f32.vlgmr.msra.gmra.mrb[0].mxu1 %v1167_v23  ;;  %v487_v41 = vadd.f32 %v455_v39, %v290_v62 }
 0x1cc   :  { %v1730_v18 = vpop.f32.mrb[2].mxu0 }
 0x1cd   :  { %v1023_v13 = vadd.f32 %v1730_v18, %v2869_v19  ;;  %v1017_v58 = vpop.f32.mrb[3].mxu0  ;;  %v210_v8 = vpop.permute.xlu1 %209  ;;  %v2059_v18 = vld [vmem:[%s2986_s2] ss:$0 sm:$0xff] }
 0x1ce   :  { %v1018_v35 = vadd.f32 %v2869_v19, %v1017_v58  ;;  %v259_v46 = vmul.f32 %v2057_v48, %v210_v8 }
 0x1cf   :  { %v1169_v47 = vmax.f32 %v1023_v13, 0.0 }
 0x1d0   :  { %v1168_v12 = vmax.f32 %v1018_v35, 0.0  ;;  %v1733_v17 = vpop.f32.mrb[4].mxu0  ;;  %v291_v13 = vadd.f32 %v2059_v18, %v259_v46  ;;  %v611_v35 = vpop.permute.xlu0 %610 }
 0x1d1   :  { %v1033_v30 = vadd.f32 %v1733_v17, %v2869_v19  ;;  %v1027_v50 = vpop.f32.mrb[5].mxu0 }
 0x1d2   :  { %v1028_v54 = vadd.f32 %v2869_v19, %v1027_v50  ;;  %1808 = vmatprep.mubr.f32.mxu1 %v1168_v12  ;;  %v599_v57 = vpop.permute.xlu1 %598 }
 0x1d3   :  { %v651_v45 = vmul.f32 %v2528_v2, %v599_v57  ;;  %1809 = vmatmul.mubr.f32.gmra.mrb[2].mxu1 %v1169_v47  ;;  %v1171_v43 = vmax.f32 %v1033_v30, 0.0  ;;  %v2061_v57 = vld [vmem:[%s2985_s1 + $0x3] ss:$0 sm:$0xff] }
 0x1d4   :  { %v1170_v29 = vmax.f32 %v1028_v54, 0.0 }
 0x1d5   :  { %v683_v3 = vadd.f32 %v651_v45, %v486_v24  ;;  %v1736_v36 = vpop.f32.mrb[6].mxu0 }
 0x1d6   :  { %v1043_v10 = vadd.f32 %v1736_v36, %v2869_v19  ;;  %v1037_v22 = vpop.f32.mrb[7].mxu0  ;;  %1811 = vmatprep.mubr.f32.mxu1 %v1170_v29  ;;  %v603_v9 = vpop.permute.xlu1 %602 }
 0x1d7   :  { %v1038_v63 = vadd.f32 %v2869_v19, %v1037_v22  ;;  %1812 = vmatmul.mubr.f32.gmra.mrb[4].mxu1 %v1171_v43  ;;  %v880_v61 = vadd.f32 %v848_v20, %v683_v3  ;;  %v652_v40 = vmul.f32 %v2528_v2, %v603_v9  ;;  %v260_v2 = vmul.f32 %v2057_v48, %v2794_v1  ;;  %v2060_v1 = vld [vmem:[%s2985_s1 + $0x2] ss:$0 sm:$0xff] }
 0x1d8   :  { %v1173_v52 = vmax.f32 %v1043_v10, 0.0  ;;  %v654_v50 = vmul.f32 %v2060_v1, %v611_v35  ;;  %v261_v3 = vmul.f32 %v2057_v48, %v2803_v42 }
 0x1d9   :  { %v1172_v11 = vmax.f32 %v1038_v63, 0.0  ;;  %v912_v21 = vmax.f32 %v880_v61, 0.0  ;;  %v684_v5 = vadd.f32 %v652_v40, %v487_v41  ;;  %v292_v38 = vadd.f32 %v2059_v18, %v260_v2 }
 0x1da   :  { %v1739_v31 = vpop.f32.mrb[8].mxu0  ;;  %v293_v61 = vadd.f32 %v2059_v18, %v261_v3 }
 0x1db   :  { %v1053_v44 = vadd.f32 %v1739_v31, %v2869_v19  ;;  %v1047_v27 = vpop.f32.mrb[9].mxu0  ;;  %1764 = vmatprep.mubr.f32.mxu0 %v912_v21  ;;  %1814 = vmatprep.mubr.f32.mxu1 %v1172_v11  ;;  %v410_v51 = vpop.permute.xlu1 %409  ;;  %v459_v31 = vmul.f32 %v2058_v32, %v422_v25 }
 0x1dc   :  { %v1048_v28 = vadd.f32 %v2869_v19, %v1047_v27  ;;  %1815 = vmatmul.mubr.f32.gmra.mrb[6].mxu1 %v1173_v52  ;;  %v456_v23 = vmul.f32 %v2058_v32, %v410_v51  ;;  %v619_v21 = vpop.permute.xlu0 %618 }
 0x1dd   :  { %v1175_v53 = vmax.f32 %v1053_v44, 0.0  ;;  %v656_v27 = vmul.f32 %v2060_v1, %v619_v21 }
 0x1de   :  { %v1174_v34 = vmax.f32 %v1048_v28, 0.0  ;;  %v488_v12 = vadd.f32 %v456_v23, %v291_v13 }
 0x1df   :  { %v414_v14 = vpop.permute.xlu1 %413 }
 0x1e0   :  { %1817 = vmatprep.mubr.f32.mxu1 %v1174_v34  ;;  %v457_v58 = vmul.f32 %v2058_v32, %v414_v14 }
 0x1e1   :  { %1818 = vmatmul.mubr.f32.gmra.mrb[8].mxu1 %v1175_v53 }
 0x1e2   :  { %v489_v30 = vadd.f32 %v457_v58, %v292_v38 }
 0x1e4   :  { %v800_v33 = vpop.permute.xlu1 %799  ;;  %v686_v37 = vadd.f32 %v654_v50, %v489_v30 }
 0x1e5   :  { %v849_v0 = vmul.f32 %v2543_v7, %v800_v33 }
 0x1e7   :  { %v881_v60 = vadd.f32 %v849_v0, %v684_v5 }
 0x1e9   :  { %v913_v6 = vmax.f32 %v881_v60, 0.0  ;;  %v607_v26 = vpop.permute.xlu1 %606 }
 0x1ea   :  { %v653_v8 = vmul.f32 %v2060_v1, %v607_v26 }
 0x1eb   :  { %1765 = vmatmul.mubr.f32.gmra.mrb[26].mxu0 %v913_v6 }
 0x1ec   :  { %v685_v54 = vadd.f32 %v653_v8, %v488_v12 }
 0x1ee   :  { %v225_v49 = vpop.permute.xlu1 %224 }
 0x1ef   :  { %v262_v36 = vmul.f32 %v2057_v48, %v225_v49 }
 0x1f1   :  { %v294_v11 = vadd.f32 %v2059_v18, %v262_v36 }
 0x1f2   :  { %v1742_v15 = vpop.f32.mrb[10].mxu0 }
 0x1f3   :  { %v1063_v7 = vadd.f32 %v1742_v15, %v2869_v19  ;;  %v1057_v4 = vpop.f32.mrb[11].mxu0  ;;  %v418_v16 = vpop.permute.xlu1 %417  ;;  %v491_v59 = vadd.f32 %v459_v31, %v294_v11 }
 0x1f4   :  { %v1058_v55 = vadd.f32 %v2869_v19, %v1057_v4  ;;  %v458_v22 = vmul.f32 %v2058_v32, %v418_v16 }
 0x1f5   :  { %v1177_v17 = vmax.f32 %v1063_v7, 0.0  ;;  %v688_v33 = vadd.f32 %v656_v27, %v491_v59 }
 0x1f6   :  { %v1176_v56 = vmax.f32 %v1058_v55, 0.0  ;;  %v490_v44 = vadd.f32 %v458_v22, %v293_v61 }
 0x1f8   :  { %1820 = vmatprep.mubr.f32.mxu1 %v1176_v56  ;;  %v804_v47 = vpop.permute.xlu1 %803 }
 0x1f9   :  { %v850_v24 = vmul.f32 %v2061_v57, %v804_v47  ;;  %1821 = vmatmul.mubr.f32.gmra.mrb[10].mxu1 %v1177_v17 }
 0x1fb   :  { %v882_v45 = vadd.f32 %v850_v24, %v685_v54 }
 0x1fc   :  { %v808_v29 = vpop.permute.xlu1 %807 }
 0x1fd   :  { %v914_v20 = vmax.f32 %v882_v45, 0.0  ;;  %v851_v43 = vmul.f32 %v2061_v57, %v808_v29 }
 0x1ff   :  { %v883_v10 = vadd.f32 %v851_v43, %v686_v37  ;;  %1767 = vmatprep.mubr.f32.mxu0 %v914_v20  ;;  %v2930_v37 = vld [vmem:[%s2990_s6] ss:$0 sm:$0xff]  ;;  %s2090_s6 = smov [#allocation2]  }
 0x200   :  { %s1579_s30 = sshll.u32 %s2090_s6, 4  ;;  %s1580_s30 = int_to_ptr.vmem [resolvable:$true] %s1579_s30 }
 0x201   :  { %v915_v9 = vmax.f32 %v883_v10, 0.0  ;;  %v615_v63 = vpop.permute.xlu1 %614  ;;  %s2062_s8 = scalar_lea.vmem %s1580_s30, 4096  ;;  %p2067_p1 = scmp.lt.s32.totalorder %s1580_s30, %s1580_s30 }
 0x202   :  { %v655_v52 = vmul.f32 %v2060_v1, %v615_v63  ;;  %p2063_p0 = scmp.ne.s32.totalorder %s1580_s30, %s2062_s8  ;;  %p2068_p2 = scmp.lt.s32.totalorder %s2062_s8, %s2062_s8 }
 0x203   :  { %1768 = vmatmul.mubr.f32.gmra.mrb[28].mxu0 %v915_v9 }
 0x204   :  { %v687_v34 = vadd.f32 %v655_v52, %v490_v44  ;;  %p2069_p3 = por %p2068_p2, %p2067_p1 }
 0x206   :  { %v1745_v51 = vpop.f32.mrb[12].mxu0  ;;  %v812_v28 = vpop.permute.xlu1 %811  ;;  %p2070_p4 = pnand %p2069_p3, %p2063_p0 }
 0x207   :  { %v1073_v42 = vadd.f32 %v1745_v51, %v2869_v19  ;;  %v852_v39 = vmul.f32 %v2061_v57, %v812_v28  ;;  %v1067_v53 = vpop.f32.mrb[13].mxu0 }
 0x208   :  { %v1068_v14 = vadd.f32 %v2869_v19, %v1067_v53 }
 0x209   :  { %v884_v62 = vadd.f32 %v852_v39, %v687_v34  ;;  %v1179_v5 = vmax.f32 %v1073_v42, 0.0 }
 0x20a   :  { %v1178_v40 = vmax.f32 %v1068_v14, 0.0  ;;  %v816_v41 = vpop.permute.xlu1 %815 }
 0x20b   :  { %v916_v0 = vmax.f32 %v884_v62, 0.0  ;;  %v853_v60 = vmul.f32 %v2061_v57, %v816_v41 }
 0x20c   :  { %1823 = vmatprep.mubr.f32.mxu1 %v1178_v40 }
 0x20d   :  { %v885_v6 = vadd.f32 %v853_v60, %v688_v33  ;;  %1770 = vmatprep.mubr.f32.mxu0 %v916_v0  ;;  %1824 = vmatmul.mubr.f32.gmra.mrb[12].mxu1 %v1179_v5 }
 0x20f   :  { %v917_v26 = vmax.f32 %v885_v6, 0.0 }
 0x211   :  { %1771 = vmatmul.mubr.f32.gmra.mrb[30].mxu0 %v917_v26 }
 0x226   :  { %v1748_v49 = vpop.f32.mrb[14].mxu0 }
 0x227   :  { %v1083_v25 = vadd.f32 %v1748_v49, %v2869_v19  ;;  %v1077_v48 = vpop.f32.mrb[15].mxu0 }
 0x228   :  { %v1078_v46 = vadd.f32 %v2869_v19, %v1077_v48 }
 0x229   :  { %v1181_v2 = vmax.f32 %v1083_v25, 0.0 }
 0x22a   :  { %v1180_v15 = vmax.f32 %v1078_v46, 0.0 }
 0x22c   :  { %1826 = vmatprep.mubr.f32.mxu1 %v1180_v15 }
 0x22d   :  { %1827 = vmatmul.mubr.f32.gmra.mrb[14].mxu1 %v1181_v2 }
 0x23e   :  { %v1751_v32 = vpop.f32.mrb[16].mxu0 }
 0x23f   :  { %v1093_v23 = vadd.f32 %v1751_v32, %v2869_v19  ;;  %v1087_v7 = vpop.f32.mrb[17].mxu0 }
 0x240   :  { %v1088_v4 = vadd.f32 %v2869_v19, %v1087_v7 }
 0x241   :  { %v1183_v55 = vmax.f32 %v1093_v23, 0.0 }
 0x242   :  { %v1182_v16 = vmax.f32 %v1088_v4, 0.0 }
 0x244   :  { %1829 = vmatprep.mubr.f32.mxu1 %v1182_v16 }
 0x245   :  { %1830 = vmatmul.mubr.f32.gmra.mrb[16].mxu1 %v1183_v55 }
 0x252   :  { %v1754_v18 = vpop.f32.mrb[18].mxu0 }
 0x253   :  { %v1103_v13 = vadd.f32 %v1754_v18, %v2869_v19  ;;  %v1097_v58 = vpop.f32.mrb[19].mxu0 }
 0x254   :  { %v1098_v1 = vadd.f32 %v2869_v19, %v1097_v58 }
 0x255   :  { %v1185_v35 = vmax.f32 %v1103_v13, 0.0 }
 0x256   :  { %v1184_v8 = vmax.f32 %v1098_v1, 0.0 }
 0x258   :  { %1832 = vmatprep.mubr.f32.mxu1 %v1184_v8 }
 0x259   :  { %1833 = vmatmul.mubr.f32.gmra.mrb[18].mxu1 %v1185_v35 }
 0x272   :  { %v1757_v56 = vpop.f32.mrb[20].mxu0 }
 0x273   :  { %v1113_v38 = vadd.f32 %v1757_v56, %v2869_v19  ;;  %v1107_v12 = vpop.f32.mrb[21].mxu0 }
 0x274   :  { %v1108_v17 = vadd.f32 %v2869_v19, %v1107_v12 }
 0x275   :  { %v1187_v30 = vmax.f32 %v1113_v38, 0.0 }
 0x276   :  { %v1186_v47 = vmax.f32 %v1108_v17, 0.0 }
 0x278   :  { %1835 = vmatprep.mubr.f32.mxu1 %v1186_v47 }
 0x279   :  { %1836 = vmatmul.mubr.f32.gmra.mrb[20].mxu1 %v1187_v30 }
 0x28a   :  { %v1760_v50 = vpop.f32.mrb[22].mxu0 }
 0x28b   :  { %v1123_v54 = vadd.f32 %v1760_v50, %v2869_v19  ;;  %v1117_v57 = vpop.f32.mrb[23].mxu0 }
 0x28c   :  { %v1118_v24 = vadd.f32 %v2869_v19, %v1117_v57 }
 0x28d   :  { %v1189_v29 = vmax.f32 %v1123_v54, 0.0 }
 0x28e   :  { %v1188_v45 = vmax.f32 %v1118_v24, 0.0 }
 0x290   :  { %1838 = vmatprep.mubr.f32.mxu1 %v1188_v45 }
 0x291   :  { %1839 = vmatmul.mubr.f32.gmra.mrb[22].mxu1 %v1189_v29 }
 0x29e   :  { %v1763_v20 = vpop.f32.mrb[24].mxu0  ;;  %v1807_v43 = vpop.f32.mrb[0].mxu1 }
 0x29f   :  { %v1133_v3 = vadd.f32 %v1763_v20, %v2869_v19  ;;  %v1293_v36 = vadd.f32 %v1807_v43, %v2930_v37  ;;  %v1127_v10 = vpop.f32.mrb[25].mxu0  ;;  %v1287_v22 = vpop.f32.mrb[1].mxu1 }
 0x2a0   :  { %v1128_v9 = vadd.f32 %v2869_v19, %v1127_v10  ;;  %v1288_v63 = vadd.f32 %v2930_v37, %v1287_v22 }
 0x2a1   :  { %v1447_v61 = vmul.f32 0.5, %v1293_v36  ;;  %v1191_v52 = vmax.f32 %v1133_v3, 0.0 }
 0x2a2   :  { %v1190_v11 = vmax.f32 %v1128_v9, 0.0  ;;  %v1446_v21 = vmul.f32 0.5, %v1288_v63 }
 0x2a3   :  { %1993 = vtanh.f32 %v1447_v61 }
 0x2a4   :  { %1995 = vtanh.f32 %v1446_v21  ;;  %1841 = vmatprep.mubr.f32.mxu1 %v1190_v11 }
 0x2a5   :  { %1842 = vmatmul.mubr.f32.gmra.mrb[24].mxu1 %v1191_v52 }
 0x2a6   :  { %v1810_v31 = vpop.f32.mrb[2].mxu1 }
 0x2a7   :  { %v1303_v44 = vadd.f32 %v1810_v31, %v2930_v37  ;;  %v1297_v27 = vpop.f32.mrb[3].mxu1 }
 0x2a8   :  { %v1298_v51 = vadd.f32 %v2930_v37, %v1297_v27 }
 0x2a9   :  { %v1449_v28 = vmul.f32 0.5, %v1303_v44 }
 0x2aa   :  { %v1448_v59 = vmul.f32 0.5, %v1298_v51  ;;  %v1813_v34 = vpop.f32.mrb[4].mxu1 }
 0x2ab   :  { %1997 = vtanh.f32 %v1449_v28  ;;  %v1313_v42 = vadd.f32 %v1813_v34, %v2930_v37  ;;  %v1307_v39 = vpop.f32.mrb[5].mxu1 }
 0x2ac   :  { %1999 = vtanh.f32 %v1448_v59  ;;  %v1308_v53 = vadd.f32 %v2930_v37, %v1307_v39 }
 0x2ad   :  { %v1994_v14 = vpop.eup %1993  ;;  %v1451_v62 = vmul.f32 0.5, %v1313_v42 }
 0x2ae   :  { %v1996_v40 = vpop.eup %1995  ;;  %v1511_v41 = vmul.f32 2.0, %v1994_v14  ;;  %v1450_v33 = vmul.f32 0.5, %v1308_v53 }
 0x2af   :  { %v1510_v5 = vmul.f32 2.0, %v1996_v40  ;;  %2001 = vtanh.f32 %v1451_v62  ;;  %v1816_v0 = vpop.f32.mrb[6].mxu1 }
 0x2b0   :  { %1543 = vst [vmem:[#allocation2 + $0x8] sm:$0xff] %v1511_v41  ;;  %2003 = vtanh.f32 %v1450_v33  ;;  %v1323_v60 = vadd.f32 %v1816_v0, %v2930_v37  ;;  %v1317_v6 = vpop.f32.mrb[7].mxu1 }
 0x2b1   :  { %1542 = vst [vmem:[#allocation2] sm:$0xff] %v1510_v5  ;;  %v1318_v26 = vadd.f32 %v2930_v37, %v1317_v6 }
 0x2b2   :  { %v1453_v49 = vmul.f32 0.5, %v1323_v60 }
 0x2b3   :  { %v1452_v25 = vmul.f32 0.5, %v1318_v26 }
 0x2b4   :  { %2005 = vtanh.f32 %v1453_v49  ;;  %v1819_v48 = vpop.f32.mrb[8].mxu1 }
 0x2b5   :  { %v1998_v46 = vpop.eup %1997  ;;  %2007 = vtanh.f32 %v1452_v25  ;;  %v1333_v15 = vadd.f32 %v1819_v48, %v2930_v37  ;;  %v1327_v2 = vpop.f32.mrb[9].mxu1 }
 0x2b6   :  { %v2000_v32 = vpop.eup %1999  ;;  %v1513_v23 = vmul.f32 2.0, %v1998_v46  ;;  %v1328_v7 = vadd.f32 %v2930_v37, %v1327_v2 }
 0x2b7   :  { %v1512_v4 = vmul.f32 2.0, %v2000_v32  ;;  %v1455_v16 = vmul.f32 0.5, %v1333_v15 }
 0x2b8   :  { %1545 = vst [vmem:[#allocation2 + $0x18] sm:$0xff] %v1513_v23  ;;  %v1454_v55 = vmul.f32 0.5, %v1328_v7 }
 0x2b9   :  { %v2002_v18 = vpop.eup %2001  ;;  %1544 = vst [vmem:[#allocation2 + $0x10] sm:$0xff] %v1512_v4  ;;  %2009 = vtanh.f32 %v1455_v16 }
 0x2ba   :  { %v2004_v13 = vpop.eup %2003  ;;  %v1515_v58 = vmul.f32 2.0, %v2002_v18  ;;  %2011 = vtanh.f32 %v1454_v55 }
 0x2bb   :  { %v1514_v1 = vmul.f32 2.0, %v2004_v13 }
 0x2bc   :  { %1547 = vst [vmem:[#allocation2 + $0x28] sm:$0xff] %v1515_v58 }
 0x2bd   :  { %1546 = vst [vmem:[#allocation2 + $0x20] sm:$0xff] %v1514_v1 }
 0x2be   :  { %v2006_v8 = vpop.eup %2005  ;;  %v1766_v35 = vpop.f32.mrb[26].mxu0 }
 0x2bf   :  { %v2008_v56 = vpop.eup %2007  ;;  %v1517_v38 = vmul.f32 2.0, %v2006_v8  ;;  %v1143_v12 = vadd.f32 %v1766_v35, %v2869_v19  ;;  %v1137_v17 = vpop.f32.mrb[27].mxu0 }
 0x2c0   :  { %v1516_v47 = vmul.f32 2.0, %v2008_v56  ;;  %v1138_v30 = vadd.f32 %v2869_v19, %v1137_v17 }
 0x2c1   :  { %1549 = vst [vmem:[#allocation2 + $0x38] sm:$0xff] %v1517_v38  ;;  %v1193_v57 = vmax.f32 %v1143_v12, 0.0 }
 0x2c2   :  { %1548 = vst [vmem:[#allocation2 + $0x30] sm:$0xff] %v1516_v47  ;;  %v1192_v50 = vmax.f32 %v1138_v30, 0.0 }
 0x2c3   :  { %v2010_v54 = vpop.eup %2009 }
 0x2c4   :  { %v2012_v24 = vpop.eup %2011  ;;  %v1519_v45 = vmul.f32 2.0, %v2010_v54  ;;  %1844 = vmatprep.mubr.f32.mxu1 %v1192_v50 }
 0x2c5   :  { %v1518_v29 = vmul.f32 2.0, %v2012_v24  ;;  %1845 = vmatmul.mubr.f32.gmra.mrb[26].mxu1 %v1193_v57 }
 0x2c6   :  { %1551 = vst [vmem:[#allocation2 + $0x48] sm:$0xff] %v1519_v45 }
 0x2c7   :  { %1550 = vst [vmem:[#allocation2 + $0x40] sm:$0xff] %v1518_v29 }
 0x2cc   :  { %v1822_v20 = vpop.f32.mrb[10].mxu1 }
 0x2cd   :  { %v1343_v43 = vadd.f32 %v1822_v20, %v2930_v37  ;;  %v1337_v3 = vpop.f32.mrb[11].mxu1 }
 0x2ce   :  { %v1338_v36 = vadd.f32 %v2930_v37, %v1337_v3 }
 0x2cf   :  { %v1457_v10 = vmul.f32 0.5, %v1343_v43 }
 0x2d0   :  { %v1456_v22 = vmul.f32 0.5, %v1338_v36 }
 0x2d1   :  { %2013 = vtanh.f32 %v1457_v10 }
 0x2d2   :  { %2015 = vtanh.f32 %v1456_v22 }
 0x2d6   :  { %v1769_v9 = vpop.f32.mrb[28].mxu0 }
 0x2d7   :  { %v1153_v63 = vadd.f32 %v1769_v9, %v2869_v19  ;;  %v1147_v61 = vpop.f32.mrb[29].mxu0 }
 0x2d8   :  { %v1148_v11 = vadd.f32 %v2869_v19, %v1147_v61 }
 0x2d9   :  { %v1195_v31 = vmax.f32 %v1153_v63, 0.0 }
 0x2da   :  { %v1194_v21 = vmax.f32 %v1148_v11, 0.0 }
 0x2db   :  { %v2014_v52 = vpop.eup %2013 }
 0x2dc   :  { %v2016_v44 = vpop.eup %2015  ;;  %v1521_v27 = vmul.f32 2.0, %v2014_v52  ;;  %1847 = vmatprep.mubr.f32.mxu1 %v1194_v21 }
 0x2dd   :  { %v1520_v51 = vmul.f32 2.0, %v2016_v44  ;;  %1848 = vmatmul.mubr.f32.gmra.mrb[28].mxu1 %v1195_v31 }
 0x2de   :  { %1553 = vst [vmem:[#allocation2 + $0x58] sm:$0xff] %v1521_v27 }
 0x2df   :  { %1552 = vst [vmem:[#allocation2 + $0x50] sm:$0xff] %v1520_v51 }
 0x2e0   :  { %v1825_v28 = vpop.f32.mrb[12].mxu1 }
 0x2e1   :  { %v1353_v59 = vadd.f32 %v1825_v28, %v2930_v37  ;;  %v1347_v34 = vpop.f32.mrb[13].mxu1 }
 0x2e2   :  { %v1348_v42 = vadd.f32 %v2930_v37, %v1347_v34 }
 0x2e3   :  { %v1459_v39 = vmul.f32 0.5, %v1353_v59 }
 0x2e4   :  { %v1458_v53 = vmul.f32 0.5, %v1348_v42  ;;  %v1772_v14 = vpop.f32.mrb[30].mxu0 }
 0x2e5   :  { %2017 = vtanh.f32 %v1459_v39  ;;  %v1163_v62 = vadd.f32 %v1772_v14, %v2869_v19  ;;  %v1157_v40 = vpop.f32.mrb[31].mxu0 }
 0x2e6   :  { %2019 = vtanh.f32 %v1458_v53  ;;  %v1158_v41 = vadd.f32 %v2869_v19, %v1157_v40 }
 0x2e7   :  { %v1197_v5 = vmax.f32 %v1163_v62, 0.0 }
 0x2e8   :  { %v1196_v33 = vmax.f32 %v1158_v41, 0.0 }
 0x2ea   :  { %1850 = vmatprep.mubr.f32.mxu1 %v1196_v33 }
 0x2eb   :  { %1851 = vmatmul.mubr.f32.gmra.mrb[30].mxu1 %v1197_v5 }
 0x2ef   :  { %v2018_v0 = vpop.eup %2017 }
 0x2f0   :  { %v2020_v60 = vpop.eup %2019  ;;  %v1523_v6 = vmul.f32 2.0, %v2018_v0 }
 0x2f1   :  { %v1522_v26 = vmul.f32 2.0, %v2020_v60 }
 0x2f2   :  { %1555 = vst [vmem:[#allocation2 + $0x68] sm:$0xff] %v1523_v6 }
 0x2f3   :  { %1554 = vst [vmem:[#allocation2 + $0x60] sm:$0xff] %v1522_v26 }
 0x300   :  { %v1828_v49 = vpop.f32.mrb[14].mxu1 }
 0x301   :  { %v1363_v25 = vadd.f32 %v1828_v49, %v2930_v37  ;;  %v1357_v48 = vpop.f32.mrb[15].mxu1 }
 0x302   :  { %v1358_v46 = vadd.f32 %v2930_v37, %v1357_v48 }
 0x303   :  { %v1461_v15 = vmul.f32 0.5, %v1363_v25 }
 0x304   :  { %v1460_v2 = vmul.f32 0.5, %v1358_v46 }
 0x305   :  { %2021 = vtanh.f32 %v1461_v15 }
 0x306   :  { %2023 = vtanh.f32 %v1460_v2 }
 0x30f   :  { %v2022_v19 = vpop.eup %2021 }
 0x310   :  { %v2024_v32 = vpop.eup %2023  ;;  %v1525_v23 = vmul.f32 2.0, %v2022_v19 }
 0x311   :  { %v1524_v7 = vmul.f32 2.0, %v2024_v32 }
 0x312   :  { %1557 = vst [vmem:[#allocation2 + $0x78] sm:$0xff] %v1525_v23 }
 0x313   :  { %1556 = vst [vmem:[#allocation2 + $0x70] sm:$0xff] %v1524_v7 }
 0x318   :  { %v1831_v4 = vpop.f32.mrb[16].mxu1 }
 0x319   :  { %v1373_v16 = vadd.f32 %v1831_v4, %v2930_v37  ;;  %v1367_v55 = vpop.f32.mrb[17].mxu1 }
 0x31a   :  { %v1368_v18 = vadd.f32 %v2930_v37, %v1367_v55 }
 0x31b   :  { %v1463_v13 = vmul.f32 0.5, %v1373_v16 }
 0x31c   :  { %v1462_v58 = vmul.f32 0.5, %v1368_v18 }
 0x31d   :  { %2025 = vtanh.f32 %v1463_v13 }
 0x31e   :  { %2027 = vtanh.f32 %v1462_v58 }
 0x327   :  { %v2026_v1 = vpop.eup %2025 }
 0x328   :  { %v2028_v8 = vpop.eup %2027  ;;  %v1527_v35 = vmul.f32 2.0, %v2026_v1 }
 0x329   :  { %v1526_v56 = vmul.f32 2.0, %v2028_v8 }
 0x32a   :  { %1559 = vst [vmem:[#allocation2 + $0x88] sm:$0xff] %v1527_v35 }
 0x32b   :  { %1558 = vst [vmem:[#allocation2 + $0x80] sm:$0xff] %v1526_v56 }
 0x32c   :  { %v1834_v38 = vpop.f32.mrb[18].mxu1 }
 0x32d   :  { %v1383_v12 = vadd.f32 %v1834_v38, %v2930_v37  ;;  %v1377_v17 = vpop.f32.mrb[19].mxu1 }
 0x32e   :  { %v1378_v47 = vadd.f32 %v2930_v37, %v1377_v17 }
 0x32f   :  { %v1465_v30 = vmul.f32 0.5, %v1383_v12 }
 0x330   :  { %v1464_v50 = vmul.f32 0.5, %v1378_v47 }
 0x331   :  { %2029 = vtanh.f32 %v1465_v30 }
 0x332   :  { %2031 = vtanh.f32 %v1464_v50 }
 0x33b   :  { %v2030_v54 = vpop.eup %2029 }
 0x33c   :  { %v2032_v57 = vpop.eup %2031  ;;  %v1529_v24 = vmul.f32 2.0, %v2030_v54 }
 0x33d   :  { %v1528_v45 = vmul.f32 2.0, %v2032_v57 }
 0x33e   :  { %1561 = vst [vmem:[#allocation2 + $0x98] sm:$0xff] %v1529_v24 }
 0x33f   :  { %1560 = vst [vmem:[#allocation2 + $0x90] sm:$0xff] %v1528_v45 }
 0x34c   :  { %v1837_v29 = vpop.f32.mrb[20].mxu1 }
 0x34d   :  { %v1393_v20 = vadd.f32 %v1837_v29, %v2930_v37  ;;  %v1387_v43 = vpop.f32.mrb[21].mxu1 }
 0x34e   :  { %v1388_v3 = vadd.f32 %v2930_v37, %v1387_v43 }
 0x34f   :  { %v1467_v36 = vmul.f32 0.5, %v1393_v20 }
 0x350   :  { %v1466_v10 = vmul.f32 0.5, %v1388_v3 }
 0x351   :  { %2033 = vtanh.f32 %v1467_v36 }
 0x352   :  { %2035 = vtanh.f32 %v1466_v10 }
 0x35b   :  { %v2034_v22 = vpop.eup %2033 }
 0x35c   :  { %v2036_v9 = vpop.eup %2035  ;;  %v1531_v63 = vmul.f32 2.0, %v2034_v22 }
 0x35d   :  { %v1530_v61 = vmul.f32 2.0, %v2036_v9 }
 0x35e   :  { %1563 = vst [vmem:[#allocation2 + $0xa8] sm:$0xff] %v1531_v63 }
 0x35f   :  { %1562 = vst [vmem:[#allocation2 + $0xa0] sm:$0xff] %v1530_v61 }
 0x364   :  { %v1840_v11 = vpop.f32.mrb[22].mxu1 }
 0x365   :  { %v1403_v21 = vadd.f32 %v1840_v11, %v2930_v37  ;;  %v1397_v52 = vpop.f32.mrb[23].mxu1 }
 0x366   :  { %v1398_v31 = vadd.f32 %v2930_v37, %v1397_v52 }
 0x367   :  { %v1469_v44 = vmul.f32 0.5, %v1403_v21 }
 0x368   :  { %v1468_v27 = vmul.f32 0.5, %v1398_v31 }
 0x369   :  { %2037 = vtanh.f32 %v1469_v44 }
 0x36a   :  { %2039 = vtanh.f32 %v1468_v27 }
 0x373   :  { %v2038_v51 = vpop.eup %2037 }
 0x374   :  { %v2040_v28 = vpop.eup %2039  ;;  %v1533_v59 = vmul.f32 2.0, %v2038_v51 }
 0x375   :  { %v1532_v34 = vmul.f32 2.0, %v2040_v28 }
 0x376   :  { %1565 = vst [vmem:[#allocation2 + $0xb8] sm:$0xff] %v1533_v59 }
 0x377   :  { %1564 = vst [vmem:[#allocation2 + $0xb0] sm:$0xff] %v1532_v34 }
 0x378   :  { %v1843_v42 = vpop.f32.mrb[24].mxu1 }
 0x379   :  { %v1413_v39 = vadd.f32 %v1843_v42, %v2930_v37  ;;  %v1407_v53 = vpop.f32.mrb[25].mxu1 }
 0x37a   :  { %v1408_v14 = vadd.f32 %v2930_v37, %v1407_v53 }
 0x37b   :  { %v1471_v62 = vmul.f32 0.5, %v1413_v39 }
 0x37c   :  { %v1470_v40 = vmul.f32 0.5, %v1408_v14 }
 0x37d   :  { %2041 = vtanh.f32 %v1471_v62 }
 0x37e   :  { %2043 = vtanh.f32 %v1470_v40 }
 0x387   :  { %v2042_v41 = vpop.eup %2041 }
 0x388   :  { %v2044_v33 = vpop.eup %2043  ;;  %v1535_v5 = vmul.f32 2.0, %v2042_v41 }
 0x389   :  { %v1534_v0 = vmul.f32 2.0, %v2044_v33 }
 0x38a   :  { %1567 = vst [vmem:[#allocation2 + $0xc8] sm:$0xff] %v1535_v5 }
 0x38b   :  { %1566 = vst [vmem:[#allocation2 + $0xc0] sm:$0xff] %v1534_v0 }
 0x398   :  { %v1846_v60 = vpop.f32.mrb[26].mxu1 }
 0x399   :  { %v1423_v6 = vadd.f32 %v1846_v60, %v2930_v37  ;;  %v1417_v26 = vpop.f32.mrb[27].mxu1 }
 0x39a   :  { %v1418_v49 = vadd.f32 %v2930_v37, %v1417_v26 }
 0x39b   :  { %v1473_v25 = vmul.f32 0.5, %v1423_v6 }
 0x39c   :  { %v1472_v48 = vmul.f32 0.5, %v1418_v49 }
 0x39d   :  { %2045 = vtanh.f32 %v1473_v25 }
 0x39e   :  { %2047 = vtanh.f32 %v1472_v48 }
 0x3a7   :  { %v2046_v46 = vpop.eup %2045 }
 0x3a8   :  { %v2048_v15 = vpop.eup %2047  ;;  %v1537_v2 = vmul.f32 2.0, %v2046_v46 }
 0x3a9   :  { %v1536_v19 = vmul.f32 2.0, %v2048_v15 }
 0x3aa   :  { %1569 = vst [vmem:[#allocation2 + $0xd8] sm:$0xff] %v1537_v2 }
 0x3ab   :  { %1568 = vst [vmem:[#allocation2 + $0xd0] sm:$0xff] %v1536_v19 }
 0x3b0   :  { %v1849_v32 = vpop.f32.mrb[28].mxu1 }
 0x3b1   :  { %v1433_v23 = vadd.f32 %v1849_v32, %v2930_v37  ;;  %v1427_v7 = vpop.f32.mrb[29].mxu1 }
 0x3b2   :  { %v1428_v4 = vadd.f32 %v2930_v37, %v1427_v7 }
 0x3b3   :  { %v1475_v16 = vmul.f32 0.5, %v1433_v23 }
 0x3b4   :  { %v1474_v55 = vmul.f32 0.5, %v1428_v4 }
 0x3b5   :  { %2049 = vtanh.f32 %v1475_v16 }
 0x3b6   :  { %2051 = vtanh.f32 %v1474_v55 }
 0x3be   :  { %v1852_v18 = vpop.f32.mrb[30].mxu1 }
 0x3bf   :  { %v2050_v13 = vpop.eup %2049  ;;  %v1443_v58 = vadd.f32 %v1852_v18, %v2930_v37  ;;  %v1437_v1 = vpop.f32.mrb[31].mxu1 }
 0x3c0   :  { %v2052_v8 = vpop.eup %2051  ;;  %v1539_v35 = vmul.f32 2.0, %v2050_v13  ;;  %v1438_v56 = vadd.f32 %v2930_v37, %v1437_v1 }
 0x3c1   :  { %v1538_v38 = vmul.f32 2.0, %v2052_v8  ;;  %v1477_v12 = vmul.f32 0.5, %v1443_v58 }
 0x3c2   :  { %1571 = vst [vmem:[#allocation2 + $0xe8] sm:$0xff] %v1539_v35  ;;  %v1476_v17 = vmul.f32 0.5, %v1438_v56 }
 0x3c3   :  { %1570 = vst [vmem:[#allocation2 + $0xe0] sm:$0xff] %v1538_v38  ;;  %2053 = vtanh.f32 %v1477_v12 }
 0x3c4   :  { %2055 = vtanh.f32 %v1476_v17 }
 0x3cd   :  { %v2054_v47 = vpop.eup %2053 }
 0x3ce   :  { %v2056_v30 = vpop.eup %2055  ;;  %v1541_v50 = vmul.f32 2.0, %v2054_v47 }
 0x3cf   :  { %v1540_v54 = vmul.f32 2.0, %v2056_v30 }
 0x3d0   :  { %1573 = vst [vmem:[#allocation2 + $0xf8] sm:$0xff] %v1541_v50 }
 0x3d1   :  { %1572 = vst [vmem:[#allocation2 + $0xf0] sm:$0xff] %v1540_v54 }
 0x3d2   :  { %2073 = shalt.err (!%p2070_p4)
}
 0x3d3   :  { %s2074_s10 = scalar_lea.hbm %s2991_s7, 4096 }
 0x3d4   :  { %p2075_p5 = scmp.ne.s32.totalorder %s2991_s7, %s2074_s10  ;;  %p2078_p6 = scmp.lt.u32.totalorder %s2074_s10, %s2991_s7 }
 0x3d6   :  { %p2080_p7 = pnand %p2078_p6, %p2075_p5 }
 0x3d8   :  { %2083 = shalt.err (!%p2080_p7)
}
 0x3d9   :  { %s2091_s15 = smov 128   ;;  %s2092_s16 = smov 8  }
 0x3da   :  { %1585 = dma.vmem_to_hbm [thread:$0]  %s1580_s30, 4096, %s2991_s7, [#allocation3], %s2091_s15, %s2091_s15, %s2092_s16  }
 0x3db   :  { %2084 = dma.done.wait [#allocation3], 4096  }
 0x3dc   :  { %2085 = vsyncadd [#allocation3], 4294963200 }
 0x3dd   :  { %1589 = vsyncpa [#allocation3], 1 }

</bundles_post_ra>
